<compile_context>
chip_gen: v6e
topology: v6e:2x2x1
jax: 0.10.0
libtpu: 0.0.40
codegen_flags: <defaults>
</compile_context>

<pallas_src>
import functools
import math

import jax
import jax.numpy as jnp
from jax.experimental import pallas as pl
from jax.experimental.pallas import tpu as pltpu

LN_EPS = 1e-5  # torch.nn.LayerNorm default


# ---------------------------------------------------------------------------
# in-kernel helpers (traced inside the Pallas kernel body, f32 math)
# ---------------------------------------------------------------------------
def _layernorm(x, g, b):
    mu = jnp.mean(x, axis=-1, keepdims=True)
    var = jnp.mean((x - mu) ** 2, axis=-1, keepdims=True)
    return (x - mu) * jax.lax.rsqrt(var + LN_EPS) * g + b


def _gelu(x):
    return jax.nn.gelu(x, approximate=True)


# ---------------------------------------------------------------------------
# fused transformer-stack kernel: one grid step = (batch element b, layer l)
# ---------------------------------------------------------------------------
def transformer_stack_kernel(
    x_ref,                                            # (1, N, D)   f32
    ln1g_ref, ln1b_ref,                               # (1, 1, D)   f32
    wqkv_ref,                                         # (1, D, 3*inner) bf16
    wo_ref,                                           # (1, heads, dh, D) bf16
    bo_ref,                                           # (1, 1, D)   f32
    ln2g_ref, ln2b_ref,                               # (1, 1, D)   f32
    w1_ref, b1_ref,                                   # (1, D, Dm) bf16 / (1,1,Dm) f32
    w2_ref, b2_ref,                                   # (1, Dm, D) bf16 / (1,1,D) f32
    nfg_ref, nfb_ref,                                 # (1, D)      f32
    o_ref,                                            # (1, N, D)   f32
    x_sc,                                             # VMEM (N, D) f32 scratch
    *, heads, dim_head, compute_dtype,
):
    layer = pl.program_id(1)
    inner = heads * dim_head
    scale = dim_head ** (-0.5)

    # Load the input sequence into the persistent activation scratch once per b.
    @pl.when(layer == 0)
    def _():
        x_sc[...] = x_ref[0].astype(jnp.float32)

    x = x_sc[...]                                      # (N, D) f32 residual stream

    # ---- AttentionVIT: x = to_out(attn(LN(x))) + x ----
    xn = _layernorm(x, ln1g_ref[0], ln1b_ref[0]).astype(compute_dtype)
    # single wide QKV projection (full-D contraction, best MXU shape)
    qkv = jnp.dot(xn, wqkv_ref[0], preferred_element_type=jnp.float32)   # (N, 3*inner) f32

    acc = jnp.zeros(x.shape, jnp.float32)              # (N, D) head-accumulate buffer
    # heads is a small python int -> static unroll; each head's result is folded
    # into acc immediately, so per-head intermediates have short live ranges.
    for h in range(heads):
        q_h = (qkv[:, h * dim_head:(h + 1) * dim_head] * scale).astype(compute_dtype)
        k_h = qkv[:, inner + h * dim_head: inner + (h + 1) * dim_head].astype(compute_dtype)
        v_h = qkv[:, 2 * inner + h * dim_head: 2 * inner + (h + 1) * dim_head].astype(compute_dtype)
        # q @ k^T without an explicit transpose node (contract last dims)
        dots = jax.lax.dot_general(
            q_h, k_h, dimension_numbers=(((1,), (1,)), ((), ())),
            preferred_element_type=jnp.float32)                        # (N, N) f32
        dots = dots - jnp.max(dots, axis=-1, keepdims=True)
        e = jnp.exp(dots)
        p = e * pl.reciprocal(jnp.sum(e, axis=-1, keepdims=True), approx=True)
        o_h = jnp.dot(p.astype(compute_dtype), v_h,
                      preferred_element_type=jnp.float32)              # (N, dh) f32
        # head-accumulate projection through W_out (head-major, no concat)
        acc = acc + jnp.dot(o_h.astype(compute_dtype), wo_ref[0, h],
                            preferred_element_type=jnp.float32)        # (N, D)
    x = acc + bo_ref[0] + x

    # ---- FeedForwardVIT: x = W2 @ GELU(W1 @ LN(x)) + x ----
    xn = _layernorm(x, ln2g_ref[0], ln2b_ref[0]).astype(compute_dtype)
    hdn = jnp.dot(xn, w1_ref[0], preferred_element_type=jnp.float32) + b1_ref[0]
    hdn = _gelu(hdn).astype(compute_dtype)
    y = jnp.dot(hdn, w2_ref[0], preferred_element_type=jnp.float32) + b2_ref[0]
    x = y + x

    x_sc[...] = x                                      # carry residual stream to layer l+1

    # final LayerNorm fused into the last layer step; single HBM writeback per b
    @pl.when(layer == pl.num_programs(1) - 1)
    def _():
        o_ref[0] = _layernorm(x, nfg_ref[...], nfb_ref[...]).astype(o_ref.dtype)


# ---------------------------------------------------------------------------
# wrapper
# ---------------------------------------------------------------------------
def _stacked_spec(shape):
    """BlockSpec for a (depth, ...) stacked weight: select layer l per grid step."""
    nd = len(shape)
    return pl.BlockSpec((1,) + tuple(shape[1:]),
                        lambda b, l, _nd=nd: (l,) + (0,) * (_nd - 1))


def _const_spec(shape):
    nd = len(shape)
    return pl.BlockSpec(tuple(shape), lambda b, l, _nd=nd: (0,) * _nd)


def transformer_vit_forward(x, params, heads, dim_head, compute_dtype=jnp.bfloat16):
    B, N, D = x.shape
    depth = params["wqkv"].shape[0]

    weights = [
        params["ln1_g"], params["ln1_b"], params["wqkv"], params["wo"], params["b_out"],
        params["ln2_g"], params["ln2_b"], params["w1"], params["b1"],
        params["w2"], params["b2"],
    ]
    finals = [params["norm_g"], params["norm_b"]]

    kernel = functools.partial(transformer_stack_kernel, heads=heads,
                               dim_head=dim_head, compute_dtype=compute_dtype)

    # explicit VMEM budget: double-buffered weights + double-buffered x in/out
    # + f32 activation scratch, with headroom; floor 32 MiB, cap 48 MiB (safe on
    # v5e/v6e/v7x scoped limits).
    isz = lambda a: jnp.dtype(a.dtype).itemsize
    per_layer_w = sum(math.prod(w.shape[1:]) * isz(w) for w in weights)
    x_tile = N * D * isz(x)
    est = 2 * per_layer_w + 4 * x_tile + N * D * 4
    vmem_limit = int(min(max(4 * est, 32 * 1024 * 1024), 48 * 1024 * 1024))

    return pl.pallas_call(
        kernel,
        out_shape=jax.ShapeDtypeStruct((B, N, D), x.dtype),
        grid=(B, depth),
        in_specs=[pl.BlockSpec((1, N, D), lambda b, l: (b, 0, 0))]
        + [_stacked_spec(w.shape) for w in weights]
        + [_const_spec(f.shape) for f in finals],
        out_specs=pl.BlockSpec((1, N, D), lambda b, l: (b, 0, 0)),
        scratch_shapes=[pltpu.VMEM((N, D), jnp.float32)],
        compiler_params=pltpu.CompilerParams(
            dimension_semantics=("parallel", "arbitrary"),
            vmem_limit_bytes=vmem_limit,
        ),
    )(x, *weights, *finals)


# ---------------------------------------------------------------------------
# deterministic synthetic parameters (shapes per TransformerVIT.__init__)
#   - matrices stored bf16 (host side), LayerNorm params / biases f32
#   - W_out stored head-major (depth, heads, dim_head, D): a pure reshape of the
#     (inner, D) math-layout weight, matching rearrange 'b h n d -> b n (h d)'.
# ---------------------------------------------------------------------------
def init_params(key, dim, depth, heads, dim_head, mlp_dim, weight_dtype=jnp.bfloat16):
    inner = heads * dim_head
    ks = jax.random.split(key, 11)
    return dict(
        ln1_g=1.0 + 0.1 * jax.random.normal(ks[0], (depth, 1, dim), jnp.float32),
        ln1_b=0.1 * jax.random.normal(ks[1], (depth, 1, dim), jnp.float32),
        wqkv=(0.05 * jax.random.normal(ks[2], (depth, dim, 3 * inner), jnp.float32)
              ).astype(weight_dtype),
        wo=(0.05 * jax.random.normal(ks[3], (depth, heads, dim_head, dim), jnp.float32)
            ).astype(weight_dtype),
        b_out=0.02 * jax.random.normal(ks[4], (depth, 1, dim), jnp.float32),
        ln2_g=1.0 + 0.1 * jax.random.normal(ks[5], (depth, 1, dim), jnp.float32),
        ln2_b=0.1 * jax.random.normal(ks[6], (depth, 1, dim), jnp.float32),
        w1=(0.05 * jax.random.normal(ks[7], (depth, dim, mlp_dim), jnp.float32)
            ).astype(weight_dtype),
        b1=0.02 * jax.random.normal(ks[8], (depth, 1, mlp_dim), jnp.float32),
        w2=(0.05 * jax.random.normal(ks[9], (depth, mlp_dim, dim), jnp.float32)
            ).astype(weight_dtype),
        b2=jnp.zeros((depth, 1, dim), jnp.float32),
        norm_g=jnp.ones((1, dim), jnp.float32),
        norm_b=jnp.zeros((1, dim), jnp.float32),
    )


# ---------------------------------------------------------------------------
# pure-JAX f32 reference (same math as the PyTorch module) for validation
# ---------------------------------------------------------------------------
def reference_forward(x, params, heads, dim_head):
    def ln(x, g, b):
        mu = jnp.mean(x, -1, keepdims=True)
        var = jnp.mean((x - mu) ** 2, -1, keepdims=True)
        return (x - mu) / jnp.sqrt(var + LN_EPS) * g + b

    inner = heads * dim_head
    scale = dim_head ** (-0.5)
    depth = params["wqkv"].shape[0]
    B, N, D = x.shape
    for l in range(depth):
        xn = ln(x, params["ln1_g"][l], params["ln1_b"][l])
        qkv = xn @ params["wqkv"][l].astype(jnp.float32)
        q, k, v = jnp.split(qkv, 3, axis=-1)
        q = q.reshape(B, N, heads, dim_head).transpose(0, 2, 1, 3)
        k = k.reshape(B, N, heads, dim_head).transpose(0, 2, 1, 3)
        v = v.reshape(B, N, heads, dim_head).transpose(0, 2, 1, 3)
        dots = jnp.einsum("bhnd,bhmd->bhnm", q, k) * scale
        attn = jax.nn.softmax(dots, axis=-1)
        out = jnp.einsum("bhnm,bhmd->bhnd", attn, v)
        out = out.transpose(0, 2, 1, 3).reshape(B, N, inner)
        wo = params["wo"][l].astype(jnp.float32).reshape(inner, D)
        x = out @ wo + params["b_out"][l] + x
        xn = ln(x, params["ln2_g"][l], params["ln2_b"][l])
        h = jax.nn.gelu(xn @ params["w1"][l].astype(jnp.float32) + params["b1"][l],
                        approximate=True)
        x = h @ params["w2"][l].astype(jnp.float32) + params["b2"][l] + x
    return ln(x, params["norm_g"], params["norm_b"])


# ---------------------------------------------------------------------------
if __name__ == "__main__":
    # small shapes consistent with the module's forward: x is (B, N, dim)
    B, N = 2, 8
    dim, depth, heads, dim_head, mlp_dim = 32, 2, 4, 8, 64

    key = jax.random.PRNGKey(0)
    kx, kp = jax.random.split(key)
    x = jax.random.normal(kx, (B, N, dim), jnp.float32)
    params = init_params(kp, dim, depth, heads, dim_head, mlp_dim)

    out = transformer_vit_forward(x, params, heads, dim_head)
    out = jax.block_until_ready(out)

    ref = reference_forward(x, params, heads, dim_head)
    assert out.shape == (B, N, dim), out.shape
    # kernel runs matmul inputs in bf16 + approx reciprocal; reference is f32,
    # so compare with a bf16-appropriate tolerance.
    max_err = float(jnp.max(jnp.abs(out - ref)))
    assert max_err < 5e-2, max_err
    print("KERNEL_OK")
</pallas_src>

<mosaic_0001>
module attributes {stable_mosaic.version = 11 : i64} {
  func.func @transformer_stack_kernel(%arg0: i32, %arg1: i32, %arg2: memref<1x8x32xf32, #tpu.memory_space<vmem>>, %arg3: memref<1x1x32xf32, #tpu.memory_space<vmem>>, %arg4: memref<1x1x32xf32, #tpu.memory_space<vmem>>, %arg5: memref<1x32x96xbf16, #tpu.memory_space<vmem>>, %arg6: memref<1x4x8x32xbf16, #tpu.memory_space<vmem>>, %arg7: memref<1x1x32xf32, #tpu.memory_space<vmem>>, %arg8: memref<1x1x32xf32, #tpu.memory_space<vmem>>, %arg9: memref<1x1x32xf32, #tpu.memory_space<vmem>>, %arg10: memref<1x32x64xbf16, #tpu.memory_space<vmem>>, %arg11: memref<1x1x64xf32, #tpu.memory_space<vmem>>, %arg12: memref<1x64x32xbf16, #tpu.memory_space<vmem>>, %arg13: memref<1x1x32xf32, #tpu.memory_space<vmem>>, %arg14: memref<1x32xf32, #tpu.memory_space<vmem>>, %arg15: memref<1x32xf32, #tpu.memory_space<vmem>>, %arg16: memref<1x8x32xf32, #tpu.memory_space<vmem>>, %arg17: memref<8x32xf32, #tpu.memory_space<vmem>>) attributes {dimension_semantics = [#tpu.dimension_semantics<parallel>, #tpu.dimension_semantics<arbitrary>], iteration_bounds = array<i64: 2, 2>, scalar_prefetch = 0 : i64, scratch_operands = 1 : i64, tpu.core_type = #tpu.core_type<tc>, window_params = [{transform_indices = @transform_0, window_bounds = array<i64: 1, 8, 32>}, {transform_indices = @transform_1, window_bounds = array<i64: 1, 1, 32>}, {transform_indices = @transform_2, window_bounds = array<i64: 1, 1, 32>}, {transform_indices = @transform_3, window_bounds = array<i64: 1, 32, 96>}, {transform_indices = @transform_4, window_bounds = array<i64: 1, 4, 8, 32>}, {transform_indices = @transform_5, window_bounds = array<i64: 1, 1, 32>}, {transform_indices = @transform_6, window_bounds = array<i64: 1, 1, 32>}, {transform_indices = @transform_7, window_bounds = array<i64: 1, 1, 32>}, {transform_indices = @transform_8, window_bounds = array<i64: 1, 32, 64>}, {transform_indices = @transform_9, window_bounds = array<i64: 1, 1, 64>}, {transform_indices = @transform_10, window_bounds = array<i64: 1, 64, 32>}, {transform_indices = @transform_11, window_bounds = array<i64: 1, 1, 32>}, {pipeline_mode = #tpu.pipeline_mode<synchronous>, transform_indices = @transform_12, window_bounds = array<i64: 1, 32>}, {pipeline_mode = #tpu.pipeline_mode<synchronous>, transform_indices = @transform_13, window_bounds = array<i64: 1, 32>}, {transform_indices = @transform_14, window_bounds = array<i64: 1, 8, 32>}]} {
    %c0_i32 = arith.constant 0 : i32
    %0 = arith.cmpi eq, %arg1, %c0_i32 : i32
    %1 = arith.extui %0 : i1 to i32
    %c0_i32_0 = arith.constant 0 : i32
    %2 = arith.cmpi ne, %1, %c0_i32_0 : i32
    scf.if %2 {
      %c0_89 = arith.constant 0 : index
      %c0_90 = arith.constant 0 : index
      %c0_91 = arith.constant 0 : index
      %204 = vector.load %arg2[%c0_89, %c0_90, %c0_91] : memref<1x8x32xf32, #tpu.memory_space<vmem>>, vector<1x8x32xf32>
      %205 = vector.shape_cast %204 : vector<1x8x32xf32> to vector<8x32xf32>
      %c0_92 = arith.constant 0 : index
      %c0_93 = arith.constant 0 : index
      %206 = vector.load %arg17[%c0_92, %c0_93] : memref<8x32xf32, #tpu.memory_space<vmem>>, vector<8x32xf32>
      tpu.vector_store %arg17[%c0_92, %c0_93], %205 {strides = array<i32>} : memref<8x32xf32, #tpu.memory_space<vmem>>, vector<8x32xf32>,
    } else {
    }
    %c0 = arith.constant 0 : index
    %c0_1 = arith.constant 0 : index
    %3 = vector.load %arg17[%c0, %c0_1] : memref<8x32xf32, #tpu.memory_space<vmem>>, vector<8x32xf32>
    %c0_2 = arith.constant 0 : index
    %c0_3 = arith.constant 0 : index
    %c0_4 = arith.constant 0 : index
    %4 = vector.load %arg3[%c0_2, %c0_3, %c0_4] : memref<1x1x32xf32, #tpu.memory_space<vmem>>, vector<1x1x32xf32>
    %5 = vector.shape_cast %4 : vector<1x1x32xf32> to vector<1x32xf32>
    %c0_5 = arith.constant 0 : index
    %c0_6 = arith.constant 0 : index
    %c0_7 = arith.constant 0 : index
    %6 = vector.load %arg4[%c0_5, %c0_6, %c0_7] : memref<1x1x32xf32, #tpu.memory_space<vmem>>, vector<1x1x32xf32>
    %7 = vector.shape_cast %6 : vector<1x1x32xf32> to vector<1x32xf32>
    %cst = arith.constant dense<0.000000e+00> : vector<8xf32>
    %8 = vector.multi_reduction <add>, %3, %cst [1] : vector<8x32xf32> to vector<8xf32>
    %9 = vector.shape_cast %8 : vector<8xf32> to vector<8x1xf32>
    %cst_8 = arith.constant 3.200000e+01 : f32
    %10 = vector.broadcast %cst_8 : f32 to vector<8x1xf32>
    %11 = arith.divf %9, %10 : vector<8x1xf32>
    %12 = vector.broadcast %11 : vector<8x1xf32> to vector<8x32xf32>
    %13 = arith.subf %3, %12 : vector<8x32xf32>
    %14 = arith.mulf %13, %13 : vector<8x32xf32>
    %cst_9 = arith.constant dense<0.000000e+00> : vector<8xf32>
    %15 = vector.multi_reduction <add>, %14, %cst_9 [1] : vector<8x32xf32> to vector<8xf32>
    %16 = vector.shape_cast %15 : vector<8xf32> to vector<8x1xf32>
    %cst_10 = arith.constant 3.200000e+01 : f32
    %17 = vector.broadcast %cst_10 : f32 to vector<8x1xf32>
    %18 = arith.divf %16, %17 : vector<8x1xf32>
    %19 = vector.broadcast %11 : vector<8x1xf32> to vector<8x32xf32>
    %20 = arith.subf %3, %19 : vector<8x32xf32>
    %cst_11 = arith.constant 9.99999974E-6 : f32
    %21 = vector.broadcast %cst_11 : f32 to vector<8x1xf32>
    %22 = arith.addf %18, %21 : vector<8x1xf32>
    %23 = math.rsqrt %22 : vector<8x1xf32>
    %24 = vector.broadcast %23 : vector<8x1xf32> to vector<8x32xf32>
    %25 = arith.mulf %20, %24 : vector<8x32xf32>
    %26 = vector.broadcast %5 : vector<1x32xf32> to vector<8x32xf32>
    %27 = arith.mulf %25, %26 : vector<8x32xf32>
    %28 = vector.broadcast %7 : vector<1x32xf32> to vector<8x32xf32>
    %29 = arith.addf %27, %28 : vector<8x32xf32>
    %30 = arith.truncf %29 : vector<8x32xf32> to vector<8x32xbf16>
    %c0_12 = arith.constant 0 : index
    %c0_13 = arith.constant 0 : index
    %c0_14 = arith.constant 0 : index
    %31 = vector.load %arg5[%c0_12, %c0_13, %c0_14] : memref<1x32x96xbf16, #tpu.memory_space<vmem>>, vector<1x32x96xbf16>
    %32 = vector.shape_cast %31 : vector<1x32x96xbf16> to vector<32x96xbf16>
    %cst_15 = arith.constant dense<0.000000e+00> : vector<8x96xf32>
    %33 = tpu.matmul %30, %32, %cst_15 {dimension_numbers = #tpu.dot_dimension_numbers<[1], [0], [0], [1], [0, 0, 1, 1], [], []>} : vector<8x32xbf16>, vector<32x96xbf16>, vector<8x96xf32> -> vector<8x96xf32>
    %cst_16 = arith.constant 0.000000e+00 : f32
    %34 = vector.broadcast %cst_16 : f32 to vector<8x32xf32>
    %35 = vector.extract_strided_slice %33 {offsets = [0, 0], sizes = [8, 8], strides = [1, 1]} : vector<8x96xf32> to vector<8x8xf32>
    %cst_17 = arith.constant 0.353553385 : f32
    %36 = vector.broadcast %cst_17 : f32 to vector<8x8xf32>
    %37 = arith.mulf %35, %36 : vector<8x8xf32>
    %38 = arith.truncf %37 : vector<8x8xf32> to vector<8x8xbf16>
    %39 = vector.extract_strided_slice %33 {offsets = [0, 32], sizes = [8, 8], strides = [1, 1]} : vector<8x96xf32> to vector<8x8xf32>
    %40 = arith.truncf %39 : vector<8x8xf32> to vector<8x8xbf16>
    %41 = vector.extract_strided_slice %33 {offsets = [0, 64], sizes = [8, 8], strides = [1, 1]} : vector<8x96xf32> to vector<8x8xf32>
    %42 = arith.truncf %41 : vector<8x8xf32> to vector<8x8xbf16>
    %cst_18 = arith.constant dense<0.000000e+00> : vector<8x8xf32>
    %43 = tpu.matmul %38, %40, %cst_18 {dimension_numbers = #tpu.dot_dimension_numbers<[1], [1], [0], [0], [0, 0, 1, 0], [], []>} : vector<8x8xbf16>, vector<8x8xbf16>, vector<8x8xf32> -> vector<8x8xf32>
    %cst_19 = arith.constant dense<0xFF800000> : vector<8xf32>
    %44 = vector.multi_reduction <maximumf>, %43, %cst_19 [1] : vector<8x8xf32> to vector<8xf32>
    %45 = vector.shape_cast %44 : vector<8xf32> to vector<8x1xf32>
    %46 = vector.broadcast %45 : vector<8x1xf32> to vector<8x8xf32>
    %47 = arith.subf %43, %46 : vector<8x8xf32>
    %48 = math.exp %47 : vector<8x8xf32>
    %cst_20 = arith.constant dense<0.000000e+00> : vector<8xf32>
    %49 = vector.multi_reduction <add>, %48, %cst_20 [1] : vector<8x8xf32> to vector<8xf32>
    %50 = vector.shape_cast %49 : vector<8xf32> to vector<8x1xf32>
    %51 = tpu.reciprocal %50 {approx = true} : vector<8x1xf32> -> vector<8x1xf32>
    %52 = vector.broadcast %51 : vector<8x1xf32> to vector<8x8xf32>
    %53 = arith.mulf %48, %52 : vector<8x8xf32>
    %54 = arith.truncf %53 : vector<8x8xf32> to vector<8x8xbf16>
    %cst_21 = arith.constant dense<0.000000e+00> : vector<8x8xf32>
    %55 = tpu.matmul %54, %42, %cst_21 {dimension_numbers = #tpu.dot_dimension_numbers<[1], [0], [0], [1], [0, 0, 1, 1], [], []>} : vector<8x8xbf16>, vector<8x8xbf16>, vector<8x8xf32> -> vector<8x8xf32>
    %56 = arith.truncf %55 : vector<8x8xf32> to vector<8x8xbf16>
    %c0_22 = arith.constant 0 : index
    %c0_23 = arith.constant 0 : index
    %c0_24 = arith.constant 0 : index
    %c0_25 = arith.constant 0 : index
    %57 = vector.load %arg6[%c0_22, %c0_23, %c0_24, %c0_25] : memref<1x4x8x32xbf16, #tpu.memory_space<vmem>>, vector<1x1x8x32xbf16>
    %58 = vector.shape_cast %57 : vector<1x1x8x32xbf16> to vector<8x32xbf16>
    %cst_26 = arith.constant dense<0.000000e+00> : vector<8x32xf32>
    %59 = tpu.matmul %56, %58, %cst_26 {dimension_numbers = #tpu.dot_dimension_numbers<[1], [0], [0], [1], [0, 0, 1, 1], [], []>} : vector<8x8xbf16>, vector<8x32xbf16>, vector<8x32xf32> -> vector<8x32xf32>
    %60 = arith.addf %34, %59 : vector<8x32xf32>
    %61 = vector.extract_strided_slice %33 {offsets = [0, 8], sizes = [8, 8], strides = [1, 1]} : vector<8x96xf32> to vector<8x8xf32>
    %cst_27 = arith.constant 0.353553385 : f32
    %62 = vector.broadcast %cst_27 : f32 to vector<8x8xf32>
    %63 = arith.mulf %61, %62 : vector<8x8xf32>
    %64 = arith.truncf %63 : vector<8x8xf32> to vector<8x8xbf16>
    %65 = vector.extract_strided_slice %33 {offsets = [0, 40], sizes = [8, 8], strides = [1, 1]} : vector<8x96xf32> to vector<8x8xf32>
    %66 = arith.truncf %65 : vector<8x8xf32> to vector<8x8xbf16>
    %67 = vector.extract_strided_slice %33 {offsets = [0, 72], sizes = [8, 8], strides = [1, 1]} : vector<8x96xf32> to vector<8x8xf32>
    %68 = arith.truncf %67 : vector<8x8xf32> to vector<8x8xbf16>
    %cst_28 = arith.constant dense<0.000000e+00> : vector<8x8xf32>
    %69 = tpu.matmul %64, %66, %cst_28 {dimension_numbers = #tpu.dot_dimension_numbers<[1], [1], [0], [0], [0, 0, 1, 0], [], []>} : vector<8x8xbf16>, vector<8x8xbf16>, vector<8x8xf32> -> vector<8x8xf32>
    %cst_29 = arith.constant dense<0xFF800000> : vector<8xf32>
    %70 = vector.multi_reduction <maximumf>, %69, %cst_29 [1] : vector<8x8xf32> to vector<8xf32>
    %71 = vector.shape_cast %70 : vector<8xf32> to vector<8x1xf32>
    %72 = vector.broadcast %71 : vector<8x1xf32> to vector<8x8xf32>
    %73 = arith.subf %69, %72 : vector<8x8xf32>
    %74 = math.exp %73 : vector<8x8xf32>
    %cst_30 = arith.constant dense<0.000000e+00> : vector<8xf32>
    %75 = vector.multi_reduction <add>, %74, %cst_30 [1] : vector<8x8xf32> to vector<8xf32>
    %76 = vector.shape_cast %75 : vector<8xf32> to vector<8x1xf32>
    %77 = tpu.reciprocal %76 {approx = true} : vector<8x1xf32> -> vector<8x1xf32>
    %78 = vector.broadcast %77 : vector<8x1xf32> to vector<8x8xf32>
    %79 = arith.mulf %74, %78 : vector<8x8xf32>
    %80 = arith.truncf %79 : vector<8x8xf32> to vector<8x8xbf16>
    %cst_31 = arith.constant dense<0.000000e+00> : vector<8x8xf32>
    %81 = tpu.matmul %80, %68, %cst_31 {dimension_numbers = #tpu.dot_dimension_numbers<[1], [0], [0], [1], [0, 0, 1, 1], [], []>} : vector<8x8xbf16>, vector<8x8xbf16>, vector<8x8xf32> -> vector<8x8xf32>
    %82 = arith.truncf %81 : vector<8x8xf32> to vector<8x8xbf16>
    %c0_32 = arith.constant 0 : index
    %c1 = arith.constant 1 : index
    %c0_33 = arith.constant 0 : index
    %c0_34 = arith.constant 0 : index
    %83 = vector.load %arg6[%c0_32, %c1, %c0_33, %c0_34] : memref<1x4x8x32xbf16, #tpu.memory_space<vmem>>, vector<1x1x8x32xbf16>
    %84 = vector.shape_cast %83 : vector<1x1x8x32xbf16> to vector<8x32xbf16>
    %cst_35 = arith.constant dense<0.000000e+00> : vector<8x32xf32>
    %85 = tpu.matmul %82, %84, %cst_35 {dimension_numbers = #tpu.dot_dimension_numbers<[1], [0], [0], [1], [0, 0, 1, 1], [], []>} : vector<8x8xbf16>, vector<8x32xbf16>, vector<8x32xf32> -> vector<8x32xf32>
    %86 = arith.addf %60, %85 : vector<8x32xf32>
    %87 = vector.extract_strided_slice %33 {offsets = [0, 16], sizes = [8, 8], strides = [1, 1]} : vector<8x96xf32> to vector<8x8xf32>
    %cst_36 = arith.constant 0.353553385 : f32
    %88 = vector.broadcast %cst_36 : f32 to vector<8x8xf32>
    %89 = arith.mulf %87, %88 : vector<8x8xf32>
    %90 = arith.truncf %89 : vector<8x8xf32> to vector<8x8xbf16>
    %91 = vector.extract_strided_slice %33 {offsets = [0, 48], sizes = [8, 8], strides = [1, 1]} : vector<8x96xf32> to vector<8x8xf32>
    %92 = arith.truncf %91 : vector<8x8xf32> to vector<8x8xbf16>
    %93 = vector.extract_strided_slice %33 {offsets = [0, 80], sizes = [8, 8], strides = [1, 1]} : vector<8x96xf32> to vector<8x8xf32>
    %94 = arith.truncf %93 : vector<8x8xf32> to vector<8x8xbf16>
    %cst_37 = arith.constant dense<0.000000e+00> : vector<8x8xf32>
    %95 = tpu.matmul %90, %92, %cst_37 {dimension_numbers = #tpu.dot_dimension_numbers<[1], [1], [0], [0], [0, 0, 1, 0], [], []>} : vector<8x8xbf16>, vector<8x8xbf16>, vector<8x8xf32> -> vector<8x8xf32>
    %cst_38 = arith.constant dense<0xFF800000> : vector<8xf32>
    %96 = vector.multi_reduction <maximumf>, %95, %cst_38 [1] : vector<8x8xf32> to vector<8xf32>
    %97 = vector.shape_cast %96 : vector<8xf32> to vector<8x1xf32>
    %98 = vector.broadcast %97 : vector<8x1xf32> to vector<8x8xf32>
    %99 = arith.subf %95, %98 : vector<8x8xf32>
    %100 = math.exp %99 : vector<8x8xf32>
    %cst_39 = arith.constant dense<0.000000e+00> : vector<8xf32>
    %101 = vector.multi_reduction <add>, %100, %cst_39 [1] : vector<8x8xf32> to vector<8xf32>
    %102 = vector.shape_cast %101 : vector<8xf32> to vector<8x1xf32>
    %103 = tpu.reciprocal %102 {approx = true} : vector<8x1xf32> -> vector<8x1xf32>
    %104 = vector.broadcast %103 : vector<8x1xf32> to vector<8x8xf32>
    %105 = arith.mulf %100, %104 : vector<8x8xf32>
    %106 = arith.truncf %105 : vector<8x8xf32> to vector<8x8xbf16>
    %cst_40 = arith.constant dense<0.000000e+00> : vector<8x8xf32>
    %107 = tpu.matmul %106, %94, %cst_40 {dimension_numbers = #tpu.dot_dimension_numbers<[1], [0], [0], [1], [0, 0, 1, 1], [], []>} : vector<8x8xbf16>, vector<8x8xbf16>, vector<8x8xf32> -> vector<8x8xf32>
    %108 = arith.truncf %107 : vector<8x8xf32> to vector<8x8xbf16>
    %c0_41 = arith.constant 0 : index
    %c2 = arith.constant 2 : index
    %c0_42 = arith.constant 0 : index
    %c0_43 = arith.constant 0 : index
    %109 = vector.load %arg6[%c0_41, %c2, %c0_42, %c0_43] : memref<1x4x8x32xbf16, #tpu.memory_space<vmem>>, vector<1x1x8x32xbf16>
    %110 = vector.shape_cast %109 : vector<1x1x8x32xbf16> to vector<8x32xbf16>
    %cst_44 = arith.constant dense<0.000000e+00> : vector<8x32xf32>
    %111 = tpu.matmul %108, %110, %cst_44 {dimension_numbers = #tpu.dot_dimension_numbers<[1], [0], [0], [1], [0, 0, 1, 1], [], []>} : vector<8x8xbf16>, vector<8x32xbf16>, vector<8x32xf32> -> vector<8x32xf32>
    %112 = arith.addf %86, %111 : vector<8x32xf32>
    %113 = vector.extract_strided_slice %33 {offsets = [0, 24], sizes = [8, 8], strides = [1, 1]} : vector<8x96xf32> to vector<8x8xf32>
    %cst_45 = arith.constant 0.353553385 : f32
    %114 = vector.broadcast %cst_45 : f32 to vector<8x8xf32>
    %115 = arith.mulf %113, %114 : vector<8x8xf32>
    %116 = arith.truncf %115 : vector<8x8xf32> to vector<8x8xbf16>
    %117 = vector.extract_strided_slice %33 {offsets = [0, 56], sizes = [8, 8], strides = [1, 1]} : vector<8x96xf32> to vector<8x8xf32>
    %118 = arith.truncf %117 : vector<8x8xf32> to vector<8x8xbf16>
    %119 = vector.extract_strided_slice %33 {offsets = [0, 88], sizes = [8, 8], strides = [1, 1]} : vector<8x96xf32> to vector<8x8xf32>
    %120 = arith.truncf %119 : vector<8x8xf32> to vector<8x8xbf16>
    %cst_46 = arith.constant dense<0.000000e+00> : vector<8x8xf32>
    %121 = tpu.matmul %116, %118, %cst_46 {dimension_numbers = #tpu.dot_dimension_numbers<[1], [1], [0], [0], [0, 0, 1, 0], [], []>} : vector<8x8xbf16>, vector<8x8xbf16>, vector<8x8xf32> -> vector<8x8xf32>
    %cst_47 = arith.constant dense<0xFF800000> : vector<8xf32>
    %122 = vector.multi_reduction <maximumf>, %121, %cst_47 [1] : vector<8x8xf32> to vector<8xf32>
    %123 = vector.shape_cast %122 : vector<8xf32> to vector<8x1xf32>
    %124 = vector.broadcast %123 : vector<8x1xf32> to vector<8x8xf32>
    %125 = arith.subf %121, %124 : vector<8x8xf32>
    %126 = math.exp %125 : vector<8x8xf32>
    %cst_48 = arith.constant dense<0.000000e+00> : vector<8xf32>
    %127 = vector.multi_reduction <add>, %126, %cst_48 [1] : vector<8x8xf32> to vector<8xf32>
    %128 = vector.shape_cast %127 : vector<8xf32> to vector<8x1xf32>
    %129 = tpu.reciprocal %128 {approx = true} : vector<8x1xf32> -> vector<8x1xf32>
    %130 = vector.broadcast %129 : vector<8x1xf32> to vector<8x8xf32>
    %131 = arith.mulf %126, %130 : vector<8x8xf32>
    %132 = arith.truncf %131 : vector<8x8xf32> to vector<8x8xbf16>
    %cst_49 = arith.constant dense<0.000000e+00> : vector<8x8xf32>
    %133 = tpu.matmul %132, %120, %cst_49 {dimension_numbers = #tpu.dot_dimension_numbers<[1], [0], [0], [1], [0, 0, 1, 1], [], []>} : vector<8x8xbf16>, vector<8x8xbf16>, vector<8x8xf32> -> vector<8x8xf32>
    %134 = arith.truncf %133 : vector<8x8xf32> to vector<8x8xbf16>
    %c0_50 = arith.constant 0 : index
    %c3 = arith.constant 3 : index
    %c0_51 = arith.constant 0 : index
    %c0_52 = arith.constant 0 : index
    %135 = vector.load %arg6[%c0_50, %c3, %c0_51, %c0_52] : memref<1x4x8x32xbf16, #tpu.memory_space<vmem>>, vector<1x1x8x32xbf16>
    %136 = vector.shape_cast %135 : vector<1x1x8x32xbf16> to vector<8x32xbf16>
    %cst_53 = arith.constant dense<0.000000e+00> : vector<8x32xf32>
    %137 = tpu.matmul %134, %136, %cst_53 {dimension_numbers = #tpu.dot_dimension_numbers<[1], [0], [0], [1], [0, 0, 1, 1], [], []>} : vector<8x8xbf16>, vector<8x32xbf16>, vector<8x32xf32> -> vector<8x32xf32>
    %138 = arith.addf %112, %137 : vector<8x32xf32>
    %c0_54 = arith.constant 0 : index
    %c0_55 = arith.constant 0 : index
    %c0_56 = arith.constant 0 : index
    %139 = vector.load %arg7[%c0_54, %c0_55, %c0_56] : memref<1x1x32xf32, #tpu.memory_space<vmem>>, vector<1x1x32xf32>
    %140 = vector.shape_cast %139 : vector<1x1x32xf32> to vector<1x32xf32>
    %141 = vector.broadcast %140 : vector<1x32xf32> to vector<8x32xf32>
    %142 = arith.addf %138, %141 : vector<8x32xf32>
    %143 = arith.addf %142, %3 : vector<8x32xf32>
    %c0_57 = arith.constant 0 : index
    %c0_58 = arith.constant 0 : index
    %c0_59 = arith.constant 0 : index
    %144 = vector.load %arg8[%c0_57, %c0_58, %c0_59] : memref<1x1x32xf32, #tpu.memory_space<vmem>>, vector<1x1x32xf32>
    %145 = vector.shape_cast %144 : vector<1x1x32xf32> to vector<1x32xf32>
    %c0_60 = arith.constant 0 : index
    %c0_61 = arith.constant 0 : index
    %c0_62 = arith.constant 0 : index
    %146 = vector.load %arg9[%c0_60, %c0_61, %c0_62] : memref<1x1x32xf32, #tpu.memory_space<vmem>>, vector<1x1x32xf32>
    %147 = vector.shape_cast %146 : vector<1x1x32xf32> to vector<1x32xf32>
    %cst_63 = arith.constant dense<0.000000e+00> : vector<8xf32>
    %148 = vector.multi_reduction <add>, %143, %cst_63 [1] : vector<8x32xf32> to vector<8xf32>
    %149 = vector.shape_cast %148 : vector<8xf32> to vector<8x1xf32>
    %cst_64 = arith.constant 3.200000e+01 : f32
    %150 = vector.broadcast %cst_64 : f32 to vector<8x1xf32>
    %151 = arith.divf %149, %150 : vector<8x1xf32>
    %152 = vector.broadcast %151 : vector<8x1xf32> to vector<8x32xf32>
    %153 = arith.subf %143, %152 : vector<8x32xf32>
    %154 = arith.mulf %153, %153 : vector<8x32xf32>
    %cst_65 = arith.constant dense<0.000000e+00> : vector<8xf32>
    %155 = vector.multi_reduction <add>, %154, %cst_65 [1] : vector<8x32xf32> to vector<8xf32>
    %156 = vector.shape_cast %155 : vector<8xf32> to vector<8x1xf32>
    %cst_66 = arith.constant 3.200000e+01 : f32
    %157 = vector.broadcast %cst_66 : f32 to vector<8x1xf32>
    %158 = arith.divf %156, %157 : vector<8x1xf32>
    %159 = vector.broadcast %151 : vector<8x1xf32> to vector<8x32xf32>
    %160 = arith.subf %143, %159 : vector<8x32xf32>
    %cst_67 = arith.constant 9.99999974E-6 : f32
    %161 = vector.broadcast %cst_67 : f32 to vector<8x1xf32>
    %162 = arith.addf %158, %161 : vector<8x1xf32>
    %163 = math.rsqrt %162 : vector<8x1xf32>
    %164 = vector.broadcast %163 : vector<8x1xf32> to vector<8x32xf32>
    %165 = arith.mulf %160, %164 : vector<8x32xf32>
    %166 = vector.broadcast %145 : vector<1x32xf32> to vector<8x32xf32>
    %167 = arith.mulf %165, %166 : vector<8x32xf32>
    %168 = vector.broadcast %147 : vector<1x32xf32> to vector<8x32xf32>
    %169 = arith.addf %167, %168 : vector<8x32xf32>
    %170 = arith.truncf %169 : vector<8x32xf32> to vector<8x32xbf16>
    %c0_68 = arith.constant 0 : index
    %c0_69 = arith.constant 0 : index
    %c0_70 = arith.constant 0 : index
    %171 = vector.load %arg10[%c0_68, %c0_69, %c0_70] : memref<1x32x64xbf16, #tpu.memory_space<vmem>>, vector<1x32x64xbf16>
    %172 = vector.shape_cast %171 : vector<1x32x64xbf16> to vector<32x64xbf16>
    %cst_71 = arith.constant dense<0.000000e+00> : vector<8x64xf32>
    %173 = tpu.matmul %170, %172, %cst_71 {dimension_numbers = #tpu.dot_dimension_numbers<[1], [0], [0], [1], [0, 0, 1, 1], [], []>} : vector<8x32xbf16>, vector<32x64xbf16>, vector<8x64xf32> -> vector<8x64xf32>
    %c0_72 = arith.constant 0 : index
    %c0_73 = arith.constant 0 : index
    %c0_74 = arith.constant 0 : index
    %174 = vector.load %arg11[%c0_72, %c0_73, %c0_74] : memref<1x1x64xf32, #tpu.memory_space<vmem>>, vector<1x1x64xf32>
    %175 = vector.shape_cast %174 : vector<1x1x64xf32> to vector<1x64xf32>
    %176 = vector.broadcast %175 : vector<1x64xf32> to vector<8x64xf32>
    %177 = arith.addf %173, %176 : vector<8x64xf32>
    %178 = arith.mulf %177, %177 : vector<8x64xf32>
    %179 = arith.mulf %177, %178 : vector<8x64xf32>
    %cst_75 = arith.constant 4.471500e-02 : f32
    %180 = vector.broadcast %cst_75 : f32 to vector<8x64xf32>
    %181 = arith.mulf %180, %179 : vector<8x64xf32>
    %182 = arith.addf %177, %181 : vector<8x64xf32>
    %cst_76 = arith.constant 0.797884583 : f32
    %183 = vector.broadcast %cst_76 : f32 to vector<8x64xf32>
    %184 = arith.mulf %183, %182 : vector<8x64xf32>
    %185 = math.tanh %184 : vector<8x64xf32>
    %cst_77 = arith.constant 1.000000e+00 : f32
    %186 = vector.broadcast %cst_77 : f32 to vector<8x64xf32>
    %187 = arith.addf %186, %185 : vector<8x64xf32>
    %cst_78 = arith.constant 5.000000e-01 : f32
    %188 = vector.broadcast %cst_78 : f32 to vector<8x64xf32>
    %189 = arith.mulf %188, %187 : vector<8x64xf32>
    %190 = arith.mulf %177, %189 : vector<8x64xf32>
    %191 = arith.truncf %190 : vector<8x64xf32> to vector<8x64xbf16>
    %c0_79 = arith.constant 0 : index
    %c0_80 = arith.constant 0 : index
    %c0_81 = arith.constant 0 : index
    %192 = vector.load %arg12[%c0_79, %c0_80, %c0_81] : memref<1x64x32xbf16, #tpu.memory_space<vmem>>, vector<1x64x32xbf16>
    %193 = vector.shape_cast %192 : vector<1x64x32xbf16> to vector<64x32xbf16>
    %cst_82 = arith.constant dense<0.000000e+00> : vector<8x32xf32>
    %194 = tpu.matmul %191, %193, %cst_82 {dimension_numbers = #tpu.dot_dimension_numbers<[1], [0], [0], [1], [0, 0, 1, 1], [], []>} : vector<8x64xbf16>, vector<64x32xbf16>, vector<8x32xf32> -> vector<8x32xf32>
    %c0_83 = arith.constant 0 : index
    %c0_84 = arith.constant 0 : index
    %c0_85 = arith.constant 0 : index
    %195 = vector.load %arg13[%c0_83, %c0_84, %c0_85] : memref<1x1x32xf32, #tpu.memory_space<vmem>>, vector<1x1x32xf32>
    %196 = vector.shape_cast %195 : vector<1x1x32xf32> to vector<1x32xf32>
    %197 = vector.broadcast %196 : vector<1x32xf32> to vector<8x32xf32>
    %198 = arith.addf %194, %197 : vector<8x32xf32>
    %199 = arith.addf %198, %143 : vector<8x32xf32>
    %c0_86 = arith.constant 0 : index
    %c0_87 = arith.constant 0 : index
    %200 = vector.load %arg17[%c0_86, %c0_87] : memref<8x32xf32, #tpu.memory_space<vmem>>, vector<8x32xf32>
    tpu.vector_store %arg17[%c0_86, %c0_87], %199 {strides = array<i32>} : memref<8x32xf32, #tpu.memory_space<vmem>>, vector<8x32xf32>,
    %c1_i32 = arith.constant 1 : i32
    %201 = arith.cmpi eq, %arg1, %c1_i32 : i32
    %202 = arith.extui %201 : i1 to i32
    %c0_i32_88 = arith.constant 0 : i32
    %203 = arith.cmpi ne, %202, %c0_i32_88 : i32
    scf.if %203 {
      %c0_89 = arith.constant 0 : index
      %c0_90 = arith.constant 0 : index
      %204 = vector.load %arg14[%c0_89, %c0_90] : memref<1x32xf32, #tpu.memory_space<vmem>>, vector<1x32xf32>
      %c0_91 = arith.constant 0 : index
      %c0_92 = arith.constant 0 : index
      %205 = vector.load %arg15[%c0_91, %c0_92] : memref<1x32xf32, #tpu.memory_space<vmem>>, vector<1x32xf32>
      %cst_93 = arith.constant dense<0.000000e+00> : vector<8xf32>
      %206 = vector.multi_reduction <add>, %199, %cst_93 [1] : vector<8x32xf32> to vector<8xf32>
      %207 = vector.shape_cast %206 : vector<8xf32> to vector<8x1xf32>
      %cst_94 = arith.constant 3.200000e+01 : f32
      %208 = vector.broadcast %cst_94 : f32 to vector<8x1xf32>
      %209 = arith.divf %207, %208 : vector<8x1xf32>
      %210 = vector.broadcast %209 : vector<8x1xf32> to vector<8x32xf32>
      %211 = arith.subf %199, %210 : vector<8x32xf32>
      %212 = arith.mulf %211, %211 : vector<8x32xf32>
      %cst_95 = arith.constant dense<0.000000e+00> : vector<8xf32>
      %213 = vector.multi_reduction <add>, %212, %cst_95 [1] : vector<8x32xf32> to vector<8xf32>
      %214 = vector.shape_cast %213 : vector<8xf32> to vector<8x1xf32>
      %cst_96 = arith.constant 3.200000e+01 : f32
      %215 = vector.broadcast %cst_96 : f32 to vector<8x1xf32>
      %216 = arith.divf %214, %215 : vector<8x1xf32>
      %217 = vector.broadcast %209 : vector<8x1xf32> to vector<8x32xf32>
      %218 = arith.subf %199, %217 : vector<8x32xf32>
      %cst_97 = arith.constant 9.99999974E-6 : f32
      %219 = vector.broadcast %cst_97 : f32 to vector<8x1xf32>
      %220 = arith.addf %216, %219 : vector<8x1xf32>
      %221 = math.rsqrt %220 : vector<8x1xf32>
      %222 = vector.broadcast %221 : vector<8x1xf32> to vector<8x32xf32>
      %223 = arith.mulf %218, %222 : vector<8x32xf32>
      %224 = vector.broadcast %204 : vector<1x32xf32> to vector<8x32xf32>
      %225 = arith.mulf %223, %224 : vector<8x32xf32>
      %226 = vector.broadcast %205 : vector<1x32xf32> to vector<8x32xf32>
      %227 = arith.addf %225, %226 : vector<8x32xf32>
      %c0_98 = arith.constant 0 : index
      %c0_99 = arith.constant 0 : index
      %c0_100 = arith.constant 0 : index
      %228 = vector.load %arg16[%c0_98, %c0_99, %c0_100] : memref<1x8x32xf32, #tpu.memory_space<vmem>>, vector<1x8x32xf32>
      %229 = vector.shape_cast %228 : vector<1x8x32xf32> to vector<8x32xf32>
      %230 = vector.shape_cast %227 : vector<8x32xf32> to vector<1x8x32xf32>
      tpu.vector_store %arg16[%c0_98, %c0_99, %c0_100], %230 {strides = array<i32>} : memref<1x8x32xf32, #tpu.memory_space<vmem>>, vector<1x8x32xf32>,
    } else {
    }
    return
  }
  func.func @transform_0(%arg0: i32, %arg1: i32) -> (i32, i32, i32) {
    %c0_i32 = arith.constant 0 : i32
    %c0_i32_0 = arith.constant 0 : i32
    %c0_i32_1 = arith.constant 0 : i32
    return %arg0, %c0_i32, %c0_i32_0 : i32, i32, i32
  }
  func.func @transform_1(%arg0: i32, %arg1: i32) -> (i32, i32, i32) {
    %c0_i32 = arith.constant 0 : i32
    %c0_i32_0 = arith.constant 0 : i32
    %c0_i32_1 = arith.constant 0 : i32
    return %arg1, %c0_i32, %c0_i32_0 : i32, i32, i32
  }
  func.func @transform_2(%arg0: i32, %arg1: i32) -> (i32, i32, i32) {
    %c0_i32 = arith.constant 0 : i32
    %c0_i32_0 = arith.constant 0 : i32
    %c0_i32_1 = arith.constant 0 : i32
    return %arg1, %c0_i32, %c0_i32_0 : i32, i32, i32
  }
  func.func @transform_3(%arg0: i32, %arg1: i32) -> (i32, i32, i32) {
    %c0_i32 = arith.constant 0 : i32
    %c0_i32_0 = arith.constant 0 : i32
    %c0_i32_1 = arith.constant 0 : i32
    return %arg1, %c0_i32, %c0_i32_0 : i32, i32, i32
  }
  func.func @transform_4(%arg0: i32, %arg1: i32) -> (i32, i32, i32, i32) {
    %c0_i32 = arith.constant 0 : i32
    %c0_i32_0 = arith.constant 0 : i32
    %c0_i32_1 = arith.constant 0 : i32
    %c0_i32_2 = arith.constant 0 : i32
    return %arg1, %c0_i32, %c0_i32_0, %c0_i32_1 : i32, i32, i32, i32
  }
  func.func @transform_5(%arg0: i32, %arg1: i32) -> (i32, i32, i32) {
    %c0_i32 = arith.constant 0 : i32
    %c0_i32_0 = arith.constant 0 : i32
    %c0_i32_1 = arith.constant 0 : i32
    return %arg1, %c0_i32, %c0_i32_0 : i32, i32, i32
  }
  func.func @transform_6(%arg0: i32, %arg1: i32) -> (i32, i32, i32) {
    %c0_i32 = arith.constant 0 : i32
    %c0_i32_0 = arith.constant 0 : i32
    %c0_i32_1 = arith.constant 0 : i32
    return %arg1, %c0_i32, %c0_i32_0 : i32, i32, i32
  }
  func.func @transform_7(%arg0: i32, %arg1: i32) -> (i32, i32, i32) {
    %c0_i32 = arith.constant 0 : i32
    %c0_i32_0 = arith.constant 0 : i32
    %c0_i32_1 = arith.constant 0 : i32
    return %arg1, %c0_i32, %c0_i32_0 : i32, i32, i32
  }
  func.func @transform_8(%arg0: i32, %arg1: i32) -> (i32, i32, i32) {
    %c0_i32 = arith.constant 0 : i32
    %c0_i32_0 = arith.constant 0 : i32
    %c0_i32_1 = arith.constant 0 : i32
    return %arg1, %c0_i32, %c0_i32_0 : i32, i32, i32
  }
  func.func @transform_9(%arg0: i32, %arg1: i32) -> (i32, i32, i32) {
    %c0_i32 = arith.constant 0 : i32
    %c0_i32_0 = arith.constant 0 : i32
    %c0_i32_1 = arith.constant 0 : i32
    return %arg1, %c0_i32, %c0_i32_0 : i32, i32, i32
  }
  func.func @transform_10(%arg0: i32, %arg1: i32) -> (i32, i32, i32) {
    %c0_i32 = arith.constant 0 : i32
    %c0_i32_0 = arith.constant 0 : i32
    %c0_i32_1 = arith.constant 0 : i32
    return %arg1, %c0_i32, %c0_i32_0 : i32, i32, i32
  }
  func.func @transform_11(%arg0: i32, %arg1: i32) -> (i32, i32, i32) {
    %c0_i32 = arith.constant 0 : i32
    %c0_i32_0 = arith.constant 0 : i32
    %c0_i32_1 = arith.constant 0 : i32
    return %arg1, %c0_i32, %c0_i32_0 : i32, i32, i32
  }
  func.func @transform_12(%arg0: i32, %arg1: i32) -> (i32, i32) {
    %c0_i32 = arith.constant 0 : i32
    %c0_i32_0 = arith.constant 0 : i32
    %c0_i32_1 = arith.constant 0 : i32
    return %c0_i32, %c0_i32_0 : i32, i32
  }
  func.func @transform_13(%arg0: i32, %arg1: i32) -> (i32, i32) {
    %c0_i32 = arith.constant 0 : i32
    %c0_i32_0 = arith.constant 0 : i32
    %c0_i32_1 = arith.constant 0 : i32
    return %c0_i32, %c0_i32_0 : i32, i32
  }
  func.func @transform_14(%arg0: i32, %arg1: i32) -> (i32, i32, i32) {
    %c0_i32 = arith.constant 0 : i32
    %c0_i32_0 = arith.constant 0 : i32
    %c0_i32_1 = arith.constant 0 : i32
    return %arg0, %c0_i32, %c0_i32_0 : i32, i32, i32
  }
}

</mosaic_0001>

<bundles_post_ra>
// kernel: tpu_custom_call.1
= control target key start
LH: loop header
LB: loop body
LE: loop exit
PB: predicated region body
PF: predicated region fallthrough
CT: control target
= control target key end

     0   :  { %s2964_s0 = inlined_call_operand.hbm [shape: f32[2,8,32], index: 0, kind: input, shape index: {}]   ;;  %s2965_s1 = inlined_call_operand.hbm [shape: f32[2,1,32], index: 1, kind: input, shape index: {}]   ;;  %s2966_s2 = inlined_call_operand.vmem [shape: f32[2,1,32], index: 2, kind: input, shape index: {}]   ;;  %s2967_s3 = inlined_call_operand.vmem [shape: bf16[2,32,96], index: 3, kind: input, shape index: {}]   ;;  %s2968_s4 = inlined_call_operand.vmem [shape: bf16[2,4,8,32], index: 4, kind: input, shape index: {}]   ;;  %s2969_s5 = inlined_call_operand.vmem [shape: f32[2,1,32], index: 5, kind: input, shape index: {}]   ;;  %s2970_s6 = inlined_call_operand.vmem [shape: f32[2,1,32], index: 6, kind: input, shape index: {}]   ;;  %s2971_s7 = inlined_call_operand.vmem [shape: f32[2,1,32], index: 7, kind: input, shape index: {}]   ;;  %s2972_s8 = inlined_call_operand.vmem [shape: bf16[2,32,64], index: 8, kind: input, shape index: {}]   ;;  %s2973_s9 = inlined_call_operand.vmem [shape: f32[2,1,64], index: 9, kind: input, shape index: {}]   ;;  %s2974_s10 = inlined_call_operand.vmem [shape: bf16[2,64,32], index: 10, kind: input, shape index: {}]   ;;  %s2975_s11 = inlined_call_operand.vmem [shape: f32[2,1,32], index: 11, kind: input, shape index: {}]   ;;  %s2976_s12 = inlined_call_operand.vmem [shape: f32[1,32], index: 12, kind: input, shape index: {}]   ;;  %s2977_s13 = inlined_call_operand.vmem [shape: f32[1,32], index: 13, kind: input, shape index: {}]   ;;  %s2978_s14 = inlined_call_operand.hbm [shape: f32[2,8,32], index: 14, kind: output, shape index: {}]  }
   0x1   :  { %2998 = sst [smem:[#allocation28_spill]] %s2964_s0 }
   0x2   :  { %2999 = sst [smem:[#allocation29_spill]] %s2965_s1 }
   0x3   :  { %3000 = sst [smem:[#allocation30_spill]] %s2967_s3 }
   0x4   :  { %3001 = sst [smem:[#allocation31_spill]] %s2968_s4 }
   0x5   :  { %3002 = sst [smem:[#allocation32_spill]] %s2971_s7 }
   0x6   :  { %3003 = sst [smem:[#allocation33_spill]] %s2972_s8 }
   0x7   :  { %3004 = sst [smem:[#allocation34_spill]] %s2973_s9 }
   0x8   :  { %3005 = sst [smem:[#allocation35_spill]] %s2974_s10 }
   0x9   :  { %3006 = sst [smem:[#allocation36_spill]] %s2975_s11 }
   0xa   :  { %3007 = sst [smem:[#allocation37_spill]] %s2976_s12 }
   0xb   :  { %3008 = sst [smem:[#allocation38_spill]] %s2977_s13 }
   0xc   :  { %3009 = sst [smem:[#allocation39_spill]] %s2978_s14 }
   0xd   :  { %19 = vsyncpa [#allocation4], 0 }
   0xe   :  { %21 = vsyncpa [#allocation4 + $0x1], 0 }
   0xf   :  { %22 = vsyncpa [#allocation7], 0 }
  0x10   :  { %24 = vsyncpa [#allocation7 + $0x1], 0 }
  0x11   :  { %25 = vsyncpa [#allocation5], 0 }
  0x12   :  { %27 = vsyncpa [#allocation5 + $0x1], 0  ;;  %s2509_s29 = smov 0   ;;  %s2511_s30 = smov 0  }
  0x13   :  { %s2513_s15 = smov 0   ;;  %s2515_s16 = smov 0  }
  0x14   :  { %s2517_s17 = smov 0   ;;  %s2519_s18 = smov 0  }
  0x15   :  { %s2521_s19 = smov 0   ;;  %s2523_s20 = smov 0  }
  0x16   :  { %s2525_s21 = smov 0   ;;  %s2527_s22 = smov 0  }
  0x17   :  { %s2529_s23 = smov 0  }
  0x18 LB: > { %3010 = sst [smem:[#allocation12_spill]] %s2380_s30  ;;  %s1886_s24 = sadd.s32 4294967295, %s2416_s23   ;;  %s2416_s23 = sphi %s2529_s23, %s33_s23   ;;  %s2412_s22 = sphi %s2527_s22, %s3074_s22   ;;  %s2408_s21 = sphi %s2525_s21, %s3073_s21   ;;  %s2404_s20 = sphi %s2523_s20, %s3072_s20   ;;  %s2400_s19 = sphi %s2521_s19, %s3071_s19   ;;  %s2396_s18 = sphi %s2519_s18, %s3070_s18   ;;  %s2392_s17 = sphi %s2517_s17, %s3069_s17   ;;  %s2388_s16 = sphi %s2515_s16, %s3068_s16   ;;  %s2384_s15 = sphi %s2513_s15, %s3067_s15   ;;  %s2380_s30 = sphi %s2511_s30, %s3066_s30   ;;  %s2376_s29 = sphi %s2509_s29, %s3065_s29  }
  0x19   : > { %3011 = sst [smem:[#allocation13_spill]] %s2384_s15  ;;  %s1887_s25 = sadd.s32 4294967294, %s2416_s23  }
  0x1a   : > { %3012 = sst [smem:[#allocation14_spill]] %s2388_s16  ;;  %p59_p0 = scmp.ne.s32.totalorder %s2396_s18, %s2392_s17 }
  0x1b   : > { %3013 = sst [smem:[#allocation15_spill]] %s2392_s17  ;;  %p2984_p1 = scmp.eq.s32.totalorder %s2416_s23, 0 }
  0x1c   : > { %3014 = sst [smem:[#allocation16_spill]] %s2396_s18  ;;  %p65_p2 = scmp.ne.s32.totalorder %s2392_s17, %s2388_s16 }
  0x1d   : > { %3015 = sst [smem:[#allocation17_spill]] %s2404_s20  ;;  %p2572_p3 = scmp.eq.s32.totalorder %s1886_s24, 0 }
  0x1e   : > { %3016 = sst [smem:[#allocation18_spill]] %s2408_s21  ;;  %p2578_p4 = por %p2984_p1, %p59_p0 }
  0x1f   : > { %3017 = sst [smem:[#allocation19_spill]] %s2412_s22  ;;  %p417_p5 = scmp.eq.s32.totalorder %s1886_s24, 3 }
  0x20   : > { %3018 = sst [smem:[#allocation20_spill]] %s2416_s23  ;;  %p2584_p6 = por %p2572_p3, %p65_p2 }
  0x21   : > { %p423_p7 = scmp.eq.s32.totalorder %s1887_s25, 3  ;;  %p2588_p8 = por %p417_p5, %p59_p0 }
  0x22   : > { %p2985_p10 = scmp.lt.s32.totalorder %s2416_s23, 4  ;;  %s449_s20 = sand.u32 1, %s2396_s18  }
  0x23   : > { %s3022_s16 = scalar_select %p2588_p8, 1, 0 }
  0x24   : > { %p2592_p9 = por %p423_p7, %p65_p2  ;;  %s1891_s13 = sshll.u32 %s2412_s22, 7 }
  0x25   : > { %3023 = sst [smem:[#allocation21_spill]] %s3022_s16  ;;  %s1890_s12 = sshll.u32 %s449_s20, 3 }
  0x26   : > { %s3024_s14 = scalar_select %p2592_p9, 1, 0 }
  0x27   : > { %s3026_s0 = sld [smem:[#allocation28_spill]]  ;;  %s453_s9 = scalar_lea.vmem [#allocation3], %s1890_s12 }
  0x28   : > { %3025 = sst [smem:[#allocation22_spill]] %s3024_s14  ;;  %s460_s8 = sshll.u32 %s453_s9, 4  ;;  %s461_s8 = int_to_ptr.vmem [resolvable:$true] %s460_s8 }
  0x29   : > { %p2606_p11 = pnand %p2985_p10, %p2578_p4  ;;  %p1893_p12 = scmp.ge.s32.totalorder %s2416_s23, 1 }
  0x2a   : > { %p550_p13 = scmp.lt.s32.totalorder %s2416_s23, 5  ;;  %s450_s14 = scalar_lea.sflag [#allocation4], %s449_s20 }
  0x2b   : > { %p2238_p0 = pneg %p2606_p11  ;;  %s2249_s16 = scalar_lea.vmem %s461_s8, 128 }
  0x2c   : > { %p2250_p2 = scmp.ne.s32.totalorder %s461_s8, %s2249_s16  ;;  %s2418_s11 = smov [#allocation3]  }
  0x2d   : > { %s458_s10 = scalar_lea.hbm %s3026_s0, %s1891_s13  ;;  %s2254_s12 = sshll.u32 %s2418_s11, 4  ;;  %s2255_s12 = int_to_ptr.vmem [resolvable:$false] %s2254_s12 }
  0x2e   : > { %p2252_p5 = pnand %p2250_p2, %p2238_p0  ;;  %s2256_s9 = scalar_lea.vmem %s2255_s12, 256 }
  0x2f   : > { %p2257_p1 = scmp.lt.s32.totalorder %s461_s8, %s2255_s12  ;;  %p2258_p4 = scmp.lt.s32.totalorder %s2256_s9, %s2249_s16 }
  0x30   : > { %p2253_p7 = pneg %p2252_p5 }
  0x31   : > { %p2259_p10 = por %p2258_p4, %p2257_p1 }
  0x33   : > { %p2260_p9 = pnand %p2259_p10, %p2253_p7 }
  0x35   : > { %2263 = shalt.err (!%p2260_p9)
}
  0x36   : > { %2093 = dma.hbm_to_vmem [thread:$0]  (!%p2606_p11), %s458_s10, 128, %s461_s8, %s450_s14  }
  0x37   : > { %s52_s13 = sadd.s32 1, %s2396_s18  ;;  %p2621_p1 = pnand %p1893_p12, %p550_p13 }
  0x38   : > { %s42_s20 = sadd.s32 1, %s2408_s21  ;;  %s78_s28 = sadd.s32 1, %s2384_s15 }
  0x39   : > { %p43_p9 = scmp.ge.s32.totalorder %s42_s20, 2  ;;  %p91_p10 = scmp.ne.s32.totalorder %s2380_s30, %s2376_s29 }
  0x3a   : > { %s3030_s24 = sadd.s32 1, %s2412_s22  ;;  %p85_p11 = scmp.ne.s32.totalorder %s2384_s15, %s2380_s30 }
  0x3b   : > { %s3076_s20 = smov (%p43_p9, %s42_s20), 0  ;;  %s3078_s24 = smov (!%p43_p9, %s3030_s24), %s2412_s22 }
  0x3c   : > { %3029 = sst [smem:[#allocation23_spill]] %s3076_s20  ;;  %s75_s8 = ssub.s32 %s2408_s21, %s3076_s20 }
  0x3d   : > { %p47_p0 = scmp.ge.s32.totalorder %s3078_s24, 2  ;;  %p76_p12 = scmp.eq.s32.totalorder %s75_s8, 0 }
  0x3e   : > { %p2640_p13 = por %p91_p10, %p2572_p3  ;;  %s467_s14 = sand.u32 1, %s2384_s15  }
  0x3f   : > { %s3080_s24 = smov (%p47_p0, %s3078_s24), 0  ;;  %p3034_p2 = scmp.eq.s32.totalorder %s2416_s23, 0 }
  0x40   : > { %3032 = sst [smem:[#allocation24_spill]] %s3080_s24  ;;  %s49_s25 = ssub.s32 %s2412_s22, %s3080_s24 }
  0x41   : > { %s2648_s29 = scalar_select %p76_p12, %s2384_s15, %s78_s28  }
  0x42   : > { %p87_p5 = por %p85_p11, %p3034_p2  ;;  %p50_p7 = scmp.eq.s32.totalorder %s49_s25, 0 }
  0x43   : > { %3033 = sst [smem:[#allocation25_spill]] %s2648_s29  ;;  %s1892_s11 = sshll.u32 %s2408_s21, 4 }
  0x44   : > { %s470_s12 = scalar_lea.vmem [#allocation6], %s467_s14  ;;  %s3036_s1 = sld [smem:[#allocation29_spill]] }
  0x45   : > { %s477_s9 = sshll.u32 %s470_s12, 4  ;;  %p3037_p3 = scmp.lt.s32.totalorder %s2416_s23, 4  ;;  %s478_s9 = int_to_ptr.vmem [resolvable:$true] %s477_s9 }
  0x46   : > { %s2656_s0 = scalar_select %p50_p7, %s2396_s18, %s52_s13  }
  0x47   : > { %p2663_p4 = pnand %p3037_p3, %p87_p5  ;;  %s468_s28 = scalar_lea.sflag [#allocation7], %s467_s14 }
  0x48   : > { %3035 = sst [smem:[#allocation26_spill]] %s2656_s0  ;;  %s2277_s25 = scalar_lea.vmem %s478_s9, 16 }
  0x49   : > { %p2266_p9 = pneg %p2663_p4  ;;  %p2278_p10 = scmp.ne.s32.totalorder %s478_s9, %s2277_s25 }
  0x4a   : > { %s475_s20 = scalar_lea.hbm %s3036_s1, %s1892_s11  ;;  %s2419_s13 = smov [#allocation6]  }
  0x4b   : > { %p2280_p11 = pnand %p2278_p10, %p2266_p9  ;;  %s2282_s12 = sshll.u32 %s2419_s13, 4  ;;  %s2283_s12 = int_to_ptr.vmem [resolvable:$false] %s2282_s12 }
  0x4c   : > { %s2284_s24 = scalar_lea.vmem %s2283_s12, 32  ;;  %p2285_p12 = scmp.lt.s32.totalorder %s478_s9, %s2283_s12 }
  0x4d   : > { %p2281_p0 = pneg %p2280_p11  ;;  %p2286_p2 = scmp.lt.s32.totalorder %s2284_s24, %s2277_s25 }
  0x4f   : > { %p2287_p7 = por %p2286_p2, %p2285_p12 }
  0x51   : > { %p2288_p8 = pnand %p2287_p7, %p2281_p0 }
  0x53   : > { %2291 = shalt.err (!%p2288_p8)
}
  0x54   : > { %2096 = dma.hbm_to_vmem [thread:$0]  (!%p2663_p4), %s475_s20, 16, %s478_s9, %s468_s28  }
  0x55   : > { %554 = sbr.rel (%p2621_p1) target bundleno = 3956 (0xf74), region = 76 }
  0x5a   : > { %s2674_s14 = sand.u32 1, %s2392_s17  }
  0x5b   : > { %3039 = sst [smem:[#allocation27_spill]] %s2674_s14  ;;  %s1894_s11 = sshll.u32 %s2674_s14, 3 }
  0x5c   : > { %s557_s27 = scalar_lea.sflag [#allocation4], %s2674_s14  ;;  %s560_s8 = scalar_lea.vmem [#allocation3], %s1894_s11 }
  0x5d   : > { %2363 = dma.done.wait (%p2584_p6), %s557_s27, 128  }
  0x5e   : > { %2365 = vsyncadd (%p2584_p6), %s557_s27, 4294967168  ;;  %s565_s7 = sand.u32 1, %s2380_s30  }
  0x5f   : > { %s566_s20 = scalar_lea.sflag [#allocation7], %s565_s7  ;;  %s2683_s16 = scalar_lea.vmem [#allocation6], %s565_s7 }
  0x60   : > { %2367 = dma.done.wait (%p2640_p13), %s566_s20, 16  }
  0x61   : > { %2369 = vsyncadd (%p2640_p13), %s566_s20, 4294967280  ;;  %p655_p8 = scmp.lt.s32.totalorder %s2400_s19, 1  ;;  %s3040_s3 = sld [smem:[#allocation30_spill]] }
  0x62   : > { %s3041_s4 = sld [smem:[#allocation31_spill]]  ;;  %p1904_p6 = scmp.ne.s32.totalorder %s2400_s19, 0 }
  0x63   : > { %s2691_s24 = scalar_select %p655_p8, %s2400_s19, 1 }
  0x64   : > { %s3042_s17 = sld [smem:[#allocation32_spill]] }
  0x65   : > { %s1945_s25 = sshll.u32 %s2691_s24, 4  ;;  %s1948_s23 = sshll.u32 %s2691_s24, 5 }
  0x66   : > { %s3045_s1 = sld [smem:[#allocation35_spill]] }
  0x67   : > { %s2701_s12 = scalar_lea.vmem %s3040_s3, %s1945_s25  ;;  %s3043_s3 = sld [smem:[#allocation33_spill]] }
  0x68   : > { %s2706_s20 = scalar_lea.vmem %s3041_s4, %s1945_s25  ;;  %s3044_s4 = sld [smem:[#allocation34_spill]] }
  0x69   : > { %s3046_s0 = sld [smem:[#allocation36_spill]] }
  0x6a   : > { %s676_s29 = scalar_lea.vmem %s3042_s17, %s2691_s24  ;;  %s2739_s17 = scalar_lea.vmem [#allocation8], %s1894_s11 }
  0x6b   : > { %697 = sbr.rel (%p1904_p6) target bundleno = 114 (0x72), region = 88 }
  0x6c   : > { %s2733_s14 = scalar_lea.vmem %s3045_s1, %s1948_s23 }
  0x6d   : > { %s2723_s15 = scalar_lea.vmem %s3043_s3, %s1945_s25 }
  0x6e   : > { %s684_s30 = scalar_lea.vmem %s3044_s4, %s2691_s24 }
  0x6f   : > { %s692_s18 = scalar_lea.vmem %s3046_s0, %s2691_s24 }
  0x70   : > { %v698_v0 = vld [vmem:[%s560_s8] sm:$0xff]  ;;  %vm699_vm0 = vcmask 261120  }
  0x71   : > { %700 = vst.msk [vmem:[#allocation2] sm:$0xff] %vm699_vm0, %v698_v0 }
  0x72 PF: > { %vm704_vm1 = vcmask 261120   ;;  %v2204_v8 = vld [vmem:[%s2701_s12 + $0x8] sm:$0xff]   ;;  %v2420_v9 = vmov 0.0   ;;  %vm2421_vm2 = vmmov 0   ;;  %v2205_v10 = vld [vmem:[%s2701_s12] sm:$0xff]   ;;  %s3047_s3 = scalar_lea.vmem %s2966_s2, %s2691_s24  ;;  %s2422_s4 = smov 96  }
  0x73   : > { %1984 = vmatprep.subr.bf16.mxu1 %v2420_v9  ;;  %1988 = vmatprep.mubr.msk.bf16.mxu1 %vm2421_vm2, %v2420_v9  ;;  %v1905_v15 = vld [vmem:[%s2683_s16] ss:$0 sm:$0xff]  ;;  %s2423_s23 = smov 120   ;;  %s2424_s11 = smov 88   ;;  %vm799_vm3 = vcmask 64512   ;;  %vm863_vm4 = vcmask 1043456  }
  0x74   : > { %1985 = vmatpush3.bf16.msra.mxu1 %v2204_v8  ;;  %1998 = vmatprep.subr.bf16.mxu0 %v2420_v9  ;;  %v1906_v17 = vld [vmem:[%s3047_s3] ss:$0 sm:$0xff]  ;;  %s2425_s8 = smov 56   ;;  %s2426_s16 = smov 64   ;;  %vm1589_vm5 = vcmask 523264  }
  0x75   : > { %1986 = vmatprep.subr.bf16.mxu1 %v2420_v9  ;;  %2000 = vmatprep.mubr.msk.bf16.mxu0 %vm2421_vm2, %v2420_v9  ;;  %s2427_s28 = smov 80   ;;  %s2428_s25 = smov 112  }
  0x76   : > { %s2429_s12 = smov 48   ;;  %s2430_s10 = smov 104  }
  0x77   : > { %s2431_s13 = smov 72   ;;  %s2432_s27 = smov 40  }
  0x78   : > { %v2742_v1 = vld [vmem:[#allocation2] sm:$0xff]  ;;  %1987 = vmatpush3.bf16.msra.mxu1 %v2205_v10  ;;  %s3048_s9 = scalar_lea.vmem %s2969_s5, %s2691_s24  ;;  %s3049_s22 = scalar_lea.vmem %s2970_s6, %s2691_s24 }
  0x79   : > { %v705_v2 = vsel %vm704_vm1, %v2742_v1, 0.0  ;;  %1992 = vmatprep.subr.bf16.mxu1 %v2420_v9  ;;  %p1938_p1 = scmp.ne.s32.totalorder %s2400_s19, 1 }
  0x7a   : > { %706 = vadd.xlane.f32.xlu0 %v705_v2  ;;  %v908_v2 = vld [vmem:[%s2706_s20] sm:$0xf]  ;;  %s3053_s19 = sld [smem:[#allocation37_spill]] (!%p1938_p1) }
 0x103   : > { %v707_v3 = vpop.xlane.xlu0 %706 }
 0x104   : > { %v709_v4 = vmul.f32 0.03125, %v707_v3  ;;  %v1073_v3 = vsel %vm863_vm4, %v908_v2, 0 }
 0x106   : > { %v710_v5 = vsub.f32 %v2742_v1, %v709_v4  ;;  %v1914_v4 = vld [vmem:[%s2706_s20 + $0x4] sm:$0xf] }
 0x108   : > { %v711_v6 = vmul.f32 %v710_v5, %v710_v5 }
 0x10a   : > { %v712_v7 = vsel %vm704_vm1, %v711_v6, 0.0 }
 0x10b   : > { %713 = vadd.xlane.f32.xlu0 %v712_v7 }
 0x194   : > { %v714_v11 = vpop.xlane.xlu0 %713 }
 0x195   : > { %v715_v12 = vmul.f32 0.03125, %v714_v11 }
 0x197   : > { %v716_v13 = vadd.f32 1e-05, %v715_v12 }
 0x199   : > { %2212 = vrsqrt.f32 %v716_v13 }
 0x1a6   : > { %v2213_v14 = vpop.eup %2212 }
 0x1a7   : > { %v718_v16 = vmul.f32 %v2213_v14, %v710_v5  ;;  %v1027_v5 = vsel %vm863_vm4, %v1914_v4, 0  ;;  %v1923_v4 = vld [vmem:[%s2706_s20 + $0xc] sm:$0xf] }
 0x1a9   : > { %v725_v18 = vmul.f32 %v1905_v15, %v718_v16 }
 0x1ab   : > { %v732_v19 = vadd.f32 %v1906_v17, %v725_v18 }
 0x1ad   : > { %v733_v20 = vpack.c.bf16 %v732_v19, %v732_v19 }
 0x1af   : > { %1989 = vmatmul.mubr.msk.bf16.vlgmr.msra.gmra.mxu1 %vm704_vm1, %v733_v20 }
 0x1b0   : > { %1994 = vmatprep.mubr.msk.bf16.mxu1 %vm2421_vm2, %v2420_v9 }
 0x26f   : > { %v787_v21 = vpop.f32.mrf.mxu1 }
 0x270   : > { %v793_v22 = vmul.f32 0.35355338, %v787_v21  ;;  %v2767_v23 = vpack.c.bf16 %v787_v21, %v787_v21 }
 0x271   : > { %v1990_v24 = vpop.f32.mrf.mxu1 }
 0x272   : > { %v2769_v25 = vpack.c.bf16 %v793_v22, %v793_v22  ;;  %797 = vrot.lane.b32.xlu1 %v2767_v23, %s2422_s4 }
 0x273   : > { %v790_v26 = vpop.f32.mrf.mxu1 }
 0x274   : > { %910 = vrot.lane.b32.xlu0 %v2769_v25, %s2423_s23 }
 0x275   : > { %v1991_v27 = vpop.f32.mrf.mxu1 }
 0x276   : > { %912 = vrot.lane.b32.xlu1 %v2767_v23, %s2424_s11 }
 0x2e4   : > { %v798_v28 = vpop.permute.xlu1 %797 }
 0x2e5   : > { %v804_v29 = vsel %vm799_vm3, %v798_v28, 0 }
 0x2e6   : > { %1993 = vmatpush3.bf16.xpose.msra.mxu1 %v804_v29  ;;  %v911_v32 = vpop.permute.xlu0 %910 }
 0x2e7   : > { %2004 = vmatprep.subr.bf16.mxu1 %v2420_v9 }
 0x2e8   : > { %v913_v30 = vpop.permute.xlu1 %912 }
 0x2e9   : > { %v918_v31 = vsel %vm799_vm3, %v913_v30, 0 }
 0x2ed   : > { %1995 = vmatmul.mubr.msk.bf16.vlgmr.msra.gmra.mxu1 %vm799_vm3, %v2769_v25 }
 0x2ee   : > { %2005 = vmatpush3.bf16.xpose.msra.mxu1 %v918_v31  ;;  %2006 = vmatprep.mubr.msk.bf16.mxu1 %vm2421_vm2, %v2420_v9 }
 0x2ef   : > { %2016 = vmatprep.subr.bf16.mxu1 %v2420_v9 }
 0x2f5   : > { %2007 = vmatmul.mubr.msk.bf16.vlgmr.msra.gmra.mxu1 %vm799_vm3, %v911_v32 }
 0x2f6   : > { %2018 = vmatprep.mubr.msk.bf16.mxu1 %vm2421_vm2, %v2420_v9  ;;  %2017 = vmatpush3.bf16.msra.mxu1 %v1027_v5 }
 0x2f7   : > { %2028 = vmatprep.subr.bf16.mxu1 %v2420_v9 }
 0x3ad   : > { %v840_v33 = vpop.f32.mrf.mxu1 }
 0x3ae   : > { %v846_v34 = vsel %vm799_vm3, %v840_v33, -inf }
 0x3af   : > { %847 = vmax.xlane.f32.xlu1 %v846_v34  ;;  %v1996_v35 = vpop.f32.mrf.mxu1 }
 0x3b1   : > { %v843_v36 = vpop.f32.mrf.mxu1 }
 0x3b3   : > { %v1997_v37 = vpop.f32.mrf.mxu1 }
 0x3b5   : > { %v954_v38 = vpop.f32.mrf.mxu1 }
 0x3b6   : > { %v960_v39 = vsel %vm799_vm3, %v954_v38, -inf }
 0x3b7   : > { %961 = vmax.xlane.f32.xlu0 %v960_v39  ;;  %v2008_v40 = vpop.f32.mrf.mxu1 }
 0x3b9   : > { %v957_v41 = vpop.f32.mrf.mxu1 }
 0x3bb   : > { %v2009_v42 = vpop.f32.mrf.mxu1 }
 0x3cd   : > { %972 = vrot.lane.b32.xlu0 %v2767_v23, %s2425_s8 }
 0x438   : > { %v848_v43 = vpop.xlane.xlu1 %847 }
 0x439   : > { %v849_v44 = vsub.f32 %v840_v33, %v848_v43 }
 0x43b   : > { %v850_v45 = vmul.f32 1.442695, %v849_v44 }
 0x43d   : > { %2214 = vpow2.f32 %v850_v45 }
 0x440   : > { %v962_v46 = vpop.xlane.xlu0 %961 }
 0x441   : > { %v963_v47 = vsub.f32 %v954_v38, %v962_v46 }
 0x443   : > { %v964_v48 = vmul.f32 1.442695, %v963_v47 }
 0x444   : > { %v973_v59 = vpop.permute.xlu0 %972 }
 0x445   : > { %2216 = vpow2.f32 %v964_v48  ;;  %v978_v61 = vsel %vm863_vm4, %v973_v59, 0 }
 0x44a   : > { %v2215_v49 = vpop.eup %2214 }
 0x44b   : > { %v852_v50 = vsel %vm799_vm3, %v2215_v49, 0.0 }
 0x44c   : > { %853 = vadd.xlane.f32.xlu1 %v852_v50 }
 0x452   : > { %v2217_v51 = vpop.eup %2216 }
 0x453   : > { %v966_v52 = vsel %vm799_vm3, %v2217_v51, 0.0 }
 0x454   : > { %967 = vadd.xlane.f32.xlu1 %v966_v52 }
 0x465   : > { %858 = vrot.lane.b32.xlu1 %v2767_v23, %s2426_s16  ;;  %s3054_s16 = sld [smem:[#allocation38_spill]] (!%p1938_p1) }
 0x469   : > { %1117 = vrot.lane.b32.xlu1 %v2767_v23, %s2427_s28 }
 0x46d   : > { %1115 = vrot.lane.b32.xlu1 %v2769_v25, %s2428_s25 }
 0x4d5   : > { %v854_v53 = vpop.xlane.xlu1 %853 }
 0x4d6   : > { %2218 = vrcp.f32 %v854_v53 }
 0x4dd   : > { %v968_v54 = vpop.xlane.xlu1 %967 }
 0x4de   : > { %2220 = vrcp.f32 %v968_v54 }
 0x4e1   : > { %v859_v55 = vpop.permute.xlu1 %858 }
 0x4e2   : > { %v865_v56 = vsel %vm863_vm4, %v859_v55, 0 }
 0x4e3   : > { %v2219_v57 = vpop.eup %2218  ;;  %1999 = vmatpush3.bf16.msra.mxu0 %v865_v56 }
 0x4e4   : > { %2010 = vmatprep.subr.bf16.mxu0 %v2420_v9  ;;  %v856_v58 = vmul.f32 %v2219_v57, %v2215_v49  ;;  %v1919_v49 = vld [vmem:[%s2706_s20 + $0x8] sm:$0xf] }
 0x4e5   : > { %v1118_v12 = vpop.permute.xlu1 %1117  ;;  %v1232_v50 = vsel %vm863_vm4, %v1919_v49, 0  ;;  %v2210_v49 = vld [vmem:[%s2733_s14 + $0x8] sm:$0xff]  }
 0x4e6   : > { %v857_v60 = vpack.c.bf16 %v856_v58, %v856_v58  ;;  %v1123_v16 = vsel %vm799_vm3, %v1118_v12, 0 }
 0x4e8   : > { %2001 = vmatmul.mubr.msk.bf16.vlgmr.msra.gmra.mxu0 %vm799_vm3, %v857_v60 }
 0x4e9   : > { %2011 = vmatpush3.bf16.msra.mxu0 %v978_v61  ;;  %2012 = vmatprep.mubr.msk.bf16.mxu0 %vm2421_vm2, %v2420_v9  ;;  %v1116_v19 = vpop.permute.xlu1 %1115 }
 0x4ea   : > { %2022 = vmatprep.subr.bf16.mxu0 %v2420_v9 }
 0x4eb   : > { %v2221_v62 = vpop.eup %2220 }
 0x4ec   : > { %v970_v63 = vmul.f32 %v2221_v62, %v2217_v51 }
 0x4ee   : > { %v971_v0 = vpack.c.bf16 %v970_v63, %v970_v63 }
 0x4f0   : > { %2013 = vmatmul.mubr.msk.bf16.vlgmr.msra.gmra.mxu0 %vm799_vm3, %v971_v0 }
 0x4f1   : > { %2024 = vmatprep.mubr.msk.bf16.mxu0 %vm2421_vm2, %v2420_v9  ;;  %2023 = vmatpush3.bf16.msra.mxu0 %v1073_v3 }
 0x4f2   : > { %2034 = vmatprep.subr.bf16.mxu0 %v2420_v9 }
 0x5a8   : > { %v901_v6 = vpop.f32.mrf.mxu0 }
 0x5a9   : > { %v907_v7 = vpack.c.bf16 %v901_v6, %v901_v6  ;;  %v1392_v6 = vsel %vm863_vm4, %v1923_v4, 0 }
 0x5aa   : > { %v2002_v8 = vpop.f32.mrf.mxu0 }
 0x5ab   : > { %2025 = vmatmul.mubr.msk.bf16.vlgmr.msra.gmra.mxu0 %vm799_vm3, %v907_v7 }
 0x5ac   : > { %v904_v10 = vpop.f32.mrf.mxu0  ;;  %2036 = vmatprep.mubr.msk.bf16.mxu0 %vm2421_vm2, %v2420_v9 }
 0x5ae   : > { %v2003_v11 = vpop.f32.mrf.mxu0 }
 0x5b0   : > { %v1014_v13 = vpop.f32.mrf.mxu0 }
 0x5b1   : > { %v1020_v14 = vpack.c.bf16 %v1014_v13, %v1014_v13 }
 0x5b2   : > { %v2014_v15 = vpop.f32.mrf.mxu0 }
 0x5b3   : > { %2019 = vmatmul.mubr.msk.bf16.vlgmr.msra.gmra.mxu1 %vm799_vm3, %v1020_v14 }
 0x5b4   : > { %2029 = vmatpush3.bf16.xpose.msra.mxu1 %v1123_v16  ;;  %v1017_v17 = vpop.f32.mrf.mxu0  ;;  %2030 = vmatprep.mubr.msk.bf16.mxu1 %vm2421_vm2, %v2420_v9 }
 0x5b5   : > { %2040 = vmatprep.subr.bf16.mxu1 %v2420_v9 }
 0x5b6   : > { %v2015_v18 = vpop.f32.mrf.mxu0 }
 0x5bb   : > { %2031 = vmatmul.mubr.msk.bf16.vlgmr.msra.gmra.mxu1 %vm799_vm3, %v1116_v19 }
 0x5bc   : > { %2042 = vmatprep.mubr.msk.bf16.mxu1 %vm2421_vm2, %v2420_v9  ;;  %2041 = vmatpush3.bf16.msra.mxu1 %v1232_v50  ;;  %v2211_v50 = vld [vmem:[%s2733_s14] sm:$0xff]  }
 0x5bd   : > { %2052 = vmatprep.subr.bf16.mxu1 %v2420_v9 }
 0x66b   : > { %v1109_v20 = vpop.f32.mrf.mxu0 }
 0x66d   : > { %v2026_v21 = vpop.f32.mrf.mxu0 }
 0x66f   : > { %v1112_v22 = vpop.f32.mrf.mxu0 }
 0x670   : > { %v1925_v22 = vld [vmem:[%s3048_s9] ss:$0 sm:$0xff] }
 0x671   : > { %v2027_v24 = vpop.f32.mrf.mxu0 }
 0x673   : > { %v1063_v26 = vpop.f32.mrf.mxu1 }
 0x674   : > { %v2820_v27 = vadd.f32 %v1109_v20, %v1063_v26 }
 0x675   : > { %v2020_v28 = vpop.f32.mrf.mxu1 }
 0x677   : > { %v1066_v29 = vpop.f32.mrf.mxu1 }
 0x679   : > { %v2021_v30 = vpop.f32.mrf.mxu1 }
 0x67b   : > { %v1159_v31 = vpop.f32.mrf.mxu1 }
 0x67c   : > { %v1165_v32 = vsel %vm799_vm3, %v1159_v31, -inf }
 0x67d   : > { %1166 = vmax.xlane.f32.xlu1 %v1165_v32  ;;  %v2032_v33 = vpop.f32.mrf.mxu1 }
 0x67f   : > { %v1162_v34 = vpop.f32.mrf.mxu1 }
 0x681   : > { %v2033_v35 = vpop.f32.mrf.mxu1 }
 0x68e   : > { %1177 = vrot.lane.b32.xlu1 %v2767_v23, %s2429_s12 }
 0x692   : > { %1275 = vrot.lane.b32.xlu1 %v2769_v25, %s2430_s10 }
 0x706   : > { %v1167_v36 = vpop.xlane.xlu1 %1166 }
 0x707   : > { %v1168_v37 = vsub.f32 %v1159_v31, %v1167_v36 }
 0x709   : > { %v1169_v38 = vmul.f32 1.442695, %v1168_v37  ;;  %v2206_v37 = vld [vmem:[%s2723_s15 + $0x8] sm:$0xff]  }
 0x70a   : > { %v1178_v39 = vpop.permute.xlu1 %1177 }
 0x70b   : > { %2222 = vpow2.f32 %v1169_v38  ;;  %v1183_v40 = vsel %vm863_vm4, %v1178_v39, 0  ;;  %v2207_v38 = vld [vmem:[%s2723_s15] sm:$0xff]  }
 0x70c   : > { %2035 = vmatpush3.bf16.msra.mxu0 %v1183_v40 }
 0x70d   : > { %2046 = vmatprep.subr.bf16.mxu0 %v2420_v9 }
 0x70e   : > { %v1276_v48 = vpop.permute.xlu1 %1275 }
 0x718   : > { %v2223_v41 = vpop.eup %2222 }
 0x719   : > { %v1171_v42 = vsel %vm799_vm3, %v2223_v41, 0.0 }
 0x71a   : > { %1172 = vadd.xlane.f32.xlu0 %v1171_v42  ;;  %v1926_v42 = vld [vmem:[%s3049_s22] ss:$0 sm:$0xff] }
 0x730   : > { %1277 = vrot.lane.b32.xlu0 %v2767_v23, %s2431_s13 }
 0x7a3   : > { %v1173_v43 = vpop.xlane.xlu0 %1172 }
 0x7a4   : > { %2224 = vrcp.f32 %v1173_v43 }
 0x7a7   : > { %v1278_v45 = vpop.permute.xlu0 %1277 }
 0x7a8   : > { %v1283_v47 = vsel %vm799_vm3, %v1278_v45, 0 }
 0x7b1   : > { %v2225_v25 = vpop.eup %2224 }
 0x7b2   : > { %v1175_v44 = vmul.f32 %v2225_v25, %v2223_v41  ;;  %v1927_v25 = vld [vmem:[%s676_s29] ss:$0 sm:$0xff] }
 0x7b4   : > { %v1176_v46 = vpack.c.bf16 %v1175_v44, %v1175_v44 }
 0x7b6   : > { %2037 = vmatmul.mubr.msk.bf16.vlgmr.msra.gmra.mxu0 %vm799_vm3, %v1176_v46 }
 0x7b7   : > { %2047 = vmatpush3.bf16.xpose.msra.mxu0 %v1283_v47  ;;  %2048 = vmatprep.mubr.msk.bf16.mxu0 %vm2421_vm2, %v2420_v9  ;;  %v2208_v47 = vld [vmem:[%s2733_s14 + $0x18] sm:$0xff]  }
 0x7b8   : > { %2058 = vmatprep.subr.bf16.mxu0 %v2420_v9 }
 0x7be   : > { %2049 = vmatmul.mubr.msk.bf16.vlgmr.msra.gmra.mxu0 %vm799_vm3, %v1276_v48  ;;  %v2209_v48 = vld [vmem:[%s2733_s14 + $0x10] sm:$0xff]  }
 0x7bf   : > { %2060 = vmatprep.mubr.msk.bf16.mxu0 %vm2421_vm2, %v2420_v9  ;;  %2059 = vmatpush3.bf16.msra.mxu0 %v1392_v6 }
 0x7c0   : > { %2072 = vmatprep.subr.bf16.mxu0 %v2420_v9 }
 0x876   : > { %v1219_v51 = vpop.f32.mrf.mxu0 }
 0x877   : > { %v1225_v52 = vpack.c.bf16 %v1219_v51, %v1219_v51  ;;  %v1928_v51 = vld [vmem:[%s684_s30] ss:$0 sm:$0xff] }
 0x878   : > { %v2038_v53 = vpop.f32.mrf.mxu0 }
 0x879   : > { %2043 = vmatmul.mubr.msk.bf16.vlgmr.msra.gmra.mxu1 %vm799_vm3, %v1225_v52 }
 0x87a   : > { %v1222_v54 = vpop.f32.mrf.mxu0  ;;  %2054 = vmatprep.mubr.msk.bf16.mxu1 %vm2421_vm2, %v2420_v9 }
 0x87c   : > { %v2039_v55 = vpop.f32.mrf.mxu0 }
 0x87e   : > { %v1319_v56 = vpop.f32.mrf.mxu0 }
 0x87f   : > { %v1325_v57 = vsel %vm799_vm3, %v1319_v56, -inf }
 0x880   : > { %1326 = vmax.xlane.f32.xlu1 %v1325_v57  ;;  %v2050_v58 = vpop.f32.mrf.mxu0 }
 0x882   : > { %v1322_v59 = vpop.f32.mrf.mxu0 }
 0x884   : > { %v2051_v60 = vpop.f32.mrf.mxu0 }
 0x909   : > { %v1327_v61 = vpop.xlane.xlu1 %1326 }
 0x90a   : > { %v1328_v62 = vsub.f32 %v1319_v56, %v1327_v61 }
 0x90c   : > { %v1329_v63 = vmul.f32 1.442695, %v1328_v62 }
 0x90e   : > { %2226 = vpow2.f32 %v1329_v63 }
 0x91b   : > { %v2227_v0 = vpop.eup %2226 }
 0x91c   : > { %v1331_v2 = vsel %vm799_vm3, %v2227_v0, 0.0 }
 0x91d   : > { %1332 = vadd.xlane.f32.xlu0 %v1331_v2 }
 0x933   : > { %1337 = vrot.lane.b32.xlu0 %v2767_v23, %s2432_s27 }
 0x939   : > { %v1268_v3 = vpop.f32.mrf.mxu1 }
 0x93a   : > { %v1274_v5 = vadd.f32 %v1268_v3, %v2820_v27  ;;  %v1932_v3 = vld [vmem:[%s692_s18] ss:$0 sm:$0xff] }
 0x93b   : > { %v2044_v7 = vpop.f32.mrf.mxu1 }
 0x93d   : > { %v1271_v8 = vpop.f32.mrf.mxu1 }
 0x93f   : > { %v2045_v10 = vpop.f32.mrf.mxu1 }
 0x9a6   : > { %v1333_v11 = vpop.xlane.xlu0 %1332 }
 0x9a7   : > { %2228 = vrcp.f32 %v1333_v11 }
 0x9aa   : > { %v1338_v12 = vpop.permute.xlu0 %1337 }
 0x9ab   : > { %v1343_v13 = vsel %vm863_vm4, %v1338_v12, 0 }
 0x9ac   : > { %2053 = vmatpush3.bf16.msra.mxu1 %v1343_v13 }
 0x9ad   : > { %2064 = vmatprep.subr.bf16.mxu1 %v2420_v9 }
 0x9b4   : > { %v2229_v23 = vpop.eup %2228 }
 0x9b5   : > { %v1335_v14 = vmul.f32 %v2229_v23, %v2227_v0 }
 0x9b7   : > { %v1336_v15 = vpack.c.bf16 %v1335_v14, %v1335_v14 }
 0x9b9   : > { %2055 = vmatmul.mubr.msk.bf16.vlgmr.msra.gmra.mxu1 %vm799_vm3, %v1336_v15 }
 0x9ba   : > { %2068 = vmatprep.mubr.msk.bf16.mxu1 %vm2421_vm2, %v2420_v9  ;;  %2065 = vmatpush3.bf16.msra.mxu1 %v2206_v37 }
 0x9bb   : > { %2066 = vmatprep.subr.bf16.mxu1 %v2420_v9 }
 0x9be   : > { %2067 = vmatpush3.bf16.msra.mxu1 %v2207_v38 }
 0xa79   : > { %v1379_v16 = vpop.f32.mrf.mxu1 }
 0xa7a   : > { %v1385_v17 = vpack.c.bf16 %v1379_v16, %v1379_v16 }
 0xa7b   : > { %v2056_v18 = vpop.f32.mrf.mxu1 }
 0xa7c   : > { %2061 = vmatmul.mubr.msk.bf16.vlgmr.msra.gmra.mxu0 %vm799_vm3, %v1385_v17 }
 0xa7d   : > { %v1382_v19 = vpop.f32.mrf.mxu1  ;;  %2080 = vmatprep.mubr.msk.bf16.mxu0 %vm2421_vm2, %v2420_v9  ;;  %2073 = vmatpush3.bf16.msra.mxu0 %v2208_v47 }
 0xa7e   : > { %2074 = vmatprep.subr.bf16.mxu0 %v2420_v9 }
 0xa7f   : > { %v2057_v20 = vpop.f32.mrf.mxu1 }
 0xa81   : > { %2075 = vmatpush3.bf16.msra.mxu0 %v2209_v48 }
 0xa82   : > { %2076 = vmatprep.subr.bf16.mxu0 %v2420_v9 }
 0xa85   : > { %2077 = vmatpush3.bf16.msra.mxu0 %v2210_v49 }
 0xa86   : > { %2078 = vmatprep.subr.bf16.mxu0 %v2420_v9 }
 0xa89   : > { %2079 = vmatpush3.bf16.msra.mxu0 %v2211_v50 }
 0xb3c   : > { %v1428_v21 = vpop.f32.mrf.mxu0 }
 0xb3d   : > { %v1434_v24 = vadd.f32 %v1428_v21, %v1274_v5 }
 0xb3e   : > { %v2062_v26 = vpop.f32.mrf.mxu0 }
 0xb3f   : > { %v1442_v27 = vadd.f32 %v1925_v22, %v1434_v24 }
 0xb40   : > { %v1431_v28 = vpop.f32.mrf.mxu0 }
 0xb41   : > { %v1443_v29 = vadd.f32 %v1442_v27, %v2742_v1 }
 0xb42   : > { %v2063_v30 = vpop.f32.mrf.mxu0 }
 0xb43   : > { %v1446_v31 = vsel %vm704_vm1, %v1443_v29, 0.0 }
 0xb44   : > { %1447 = vadd.xlane.f32.xlu1 %v1446_v31 }
 0xbcd   : > { %v1448_v32 = vpop.xlane.xlu1 %1447 }
 0xbce   : > { %v1449_v33 = vmul.f32 0.03125, %v1448_v32 }
 0xbd0   : > { %v1450_v34 = vsub.f32 %v1443_v29, %v1449_v33 }
 0xbd2   : > { %v1451_v35 = vmul.f32 %v1450_v34, %v1450_v34 }
 0xbd4   : > { %v1452_v36 = vsel %vm704_vm1, %v1451_v35, 0.0 }
 0xbd5   : > { %1453 = vadd.xlane.f32.xlu1 %v1452_v36 }
 0xc5e   : > { %v1454_v1 = vpop.xlane.xlu1 %1453 }
 0xc5f   : > { %v1455_v39 = vmul.f32 0.03125, %v1454_v1 }
 0xc61   : > { %v1456_v40 = vadd.f32 1e-05, %v1455_v39 }
 0xc63   : > { %2230 = vrsqrt.f32 %v1456_v40 }
 0xc70   : > { %v2231_v41 = vpop.eup %2230 }
 0xc71   : > { %v1458_v43 = vmul.f32 %v2231_v41, %v1450_v34 }
 0xc73   : > { %v1465_v44 = vmul.f32 %v1926_v42, %v1458_v43 }
 0xc75   : > { %v1472_v45 = vadd.f32 %v1927_v25, %v1465_v44 }
 0xc77   : > { %v1473_v46 = vpack.c.bf16 %v1472_v45, %v1472_v45 }
 0xc79   : > { %2069 = vmatmul.mubr.msk.bf16.vlgmr.msra.gmra.mxu1 %vm704_vm1, %v1473_v46 }
 0xd39   : > { %v1534_v52 = vpop.f32.mrf.mxu1 }
 0xd3a   : > { %v1535_v53 = vadd.f32 %v1928_v51, %v1534_v52 }
 0xd3b   : > { %v2070_v54 = vpop.f32.mrf.mxu1 }
 0xd3c   : > { %v1540_v55 = vmul.f32 %v1535_v53, %v1535_v53 }
 0xd3d   : > { %v1537_v56 = vpop.f32.mrf.mxu1 }
 0xd3e   : > { %v1541_v57 = vmul.f32 %v1540_v55, %v1535_v53 }
 0xd3f   : > { %v2071_v58 = vpop.f32.mrf.mxu1 }
 0xd40   : > { %v1542_v59 = vmul.f32 0.044715, %v1541_v57 }
 0xd42   : > { %v1543_v60 = vadd.f32 %v1542_v59, %v1535_v53 }
 0xd44   : > { %v1544_v61 = vmul.f32 0.7978846, %v1543_v60 }
 0xd46   : > { %2232 = vtanh.f32 %v1544_v61 }
 0xd53   : > { %v2233_v9 = vpop.eup %2232 }
 0xd54   : > { %v1546_v62 = vadd.f32 1.0, %v2233_v9 }
 0xd56   : > { %v1547_v63 = vmul.f32 0.5, %v1546_v62 }
 0xd58   : > { %v1548_v0 = vmul.f32 %v1547_v63, %v1535_v53 }
 0xd5a   : > { %v1549_v2 = vpack.c.bf16 %v1548_v0, %v1548_v0 }
 0xd5c   : > { %2081 = vmatmul.mubr.msk.bf16.vlgmr.msra.gmra.mxu0 %vm1589_vm5, %v1549_v2 }
 0xe1c   : > { %v1627_v4 = vpop.f32.mrf.mxu0 }
 0xe1d   : > { %v1628_v5 = vadd.f32 %v1932_v3, %v1627_v4 }
 0xe1e   : > { %v2082_v6 = vpop.f32.mrf.mxu0  ;;  %1638 = sbr.rel (%p1938_p1) target bundleno = 3928 (0xf58), region = 92 }
 0xe1f   : > { %v1633_v7 = vadd.f32 %v1628_v5, %v1443_v29 }
 0xe20   : > { %v1630_v8 = vpop.f32.mrf.mxu0 }
 0xe21   : > { %1634 = vst.msk [vmem:[#allocation2] sm:$0xff] %vm704_vm1, %v1633_v7 }
 0xe22   : > { %v2083_v10 = vpop.f32.mrf.mxu0 }
 0xe23   : > { %v1641_v11 = vsel %vm704_vm1, %v1633_v7, 0.0  ;;  %v1939_v20 = vld [vmem:[%s3053_s19] ss:$0 sm:$0xff] }
 0xe24   : > { %1642 = vadd.xlane.f32.xlu0 %v1641_v11  ;;  %v1940_v22 = vld [vmem:[%s3054_s16] ss:$0 sm:$0xff] }
 0xead   : > { %v1643_v12 = vpop.xlane.xlu0 %1642 }
 0xeae   : > { %v1644_v13 = vmul.f32 0.03125, %v1643_v12 }
 0xeb0   : > { %v1645_v23 = vsub.f32 %v1633_v7, %v1644_v13 }
 0xeb2   : > { %v1646_v14 = vmul.f32 %v1645_v23, %v1645_v23 }
 0xeb4   : > { %v1647_v15 = vsel %vm704_vm1, %v1646_v14, 0.0 }
 0xeb5   : > { %1648 = vadd.xlane.f32.xlu0 %v1647_v15 }
 0xf3e   : > { %v1649_v16 = vpop.xlane.xlu0 %1648 }
 0xf3f   : > { %v1650_v17 = vmul.f32 0.03125, %v1649_v16 }
 0xf41   : > { %v1651_v18 = vadd.f32 1e-05, %v1650_v17 }
 0xf43   : > { %2234 = vrsqrt.f32 %v1651_v18 }
 0xf50   : > { %v2235_v19 = vpop.eup %2234 }
 0xf51   : > { %v1653_v21 = vmul.f32 %v2235_v19, %v1645_v23 }
 0xf53   : > { %v1660_v24 = vmul.f32 %v1939_v20, %v1653_v21 }
 0xf55   : > { %v1667_v26 = vadd.f32 %v1940_v22, %v1660_v24 }
 0xf57   : > { %1668 = vst.msk [vmem:[%s2739_s17] sm:$0xff] %vm704_vm1, %v1667_v26 }
 0xf58 PF: > { %s3055_s28 = sld [smem:[#allocation17_spill]]  ;;  %s1683_s26 = sshll.u32 %s2739_s17, 4  ;;  %s1684_s26 = int_to_ptr.vmem [resolvable:$true] %s1683_s26 }
 0xf59   : > { %s3056_s25 = sld [smem:[#allocation27_spill]]  ;;  %s2292_s22 = scalar_lea.vmem %s1684_s26, 128 }
 0xf5a   : > { %s3057_s12 = sld [smem:[#allocation21_spill]]  ;;  %p2293_p13 = scmp.ne.s32.totalorder %s1684_s26, %s2292_s22 }
 0xf5b   : > { %s3058_s20 = sld [smem:[#allocation39_spill]]  ;;  %s2433_s0 = smov [#allocation8]  }
 0xf5c   : > { %s2296_s1 = sshll.u32 %s2433_s0, 4  ;;  %s2297_s1 = int_to_ptr.vmem [resolvable:$false] %s2296_s1 }
 0xf5d   : > { %s2298_s15 = scalar_lea.vmem %s2297_s1, 256  ;;  %p2299_p9 = scmp.lt.s32.totalorder %s1684_s26, %s2297_s1 }
 0xf5e   : > { %s1942_s10 = sshll.u32 %s3055_s28, 7  ;;  %p2300_p10 = scmp.lt.s32.totalorder %s2298_s15, %s2292_s22 }
 0xf5f   : > { %s1670_s21 = scalar_lea.sflag [#allocation5], %s3056_s25 }
 0xf60   : > { %p3060_p5 = scmp.ne.s32.totalorder %s3057_s12, 0  ;;  %p2301_p11 = por %p2300_p10, %p2299_p9 }
 0xf61   : > { %s3059_s7 = smov %s3058_s20  ;;  %s1681_s9 = scalar_lea.hbm %s3058_s20, %s1942_s10 }
 0xf62   : > { %p2294_p3 = pnand %p2293_p13, %p3060_p5 }
 0xf64   : > { %p2295_p4 = pneg %p2294_p3 }
 0xf66   : > { %p2302_p0 = pnand %p2301_p11, %p2295_p4 }
 0xf68   : > { %2305 = shalt.err (!%p2302_p0)
}
 0xf69   : > { %s2306_s29 = scalar_lea.hbm %s1681_s9, 128  ;;  %s2310_s4 = scalar_lea.hbm %s3059_s7, 256 }
 0xf6a   : > { %p2307_p12 = scmp.ne.s32.totalorder %s1681_s9, %s2306_s29  ;;  %p2311_p8 = scmp.lt.s32.totalorder %s1681_s9, %s3059_s7 }
 0xf6b   : > { %p2312_p6 = scmp.lt.s32.totalorder %s2310_s4, %s2306_s29 }
 0xf6c   : > { %p2308_p2 = pnand %p2307_p12, %p3060_p5 }
 0xf6d   : > { %p2313_p1 = por %p2312_p6, %p2311_p8 }
 0xf6e   : > { %p2309_p7 = pneg %p2308_p2 }
 0xf70   : > { %p2314_p13 = pnand %p2313_p1, %p2309_p7 }
 0xf72   : > { %2317 = shalt.err (!%p2314_p13)
}
 0xf73   : > { %2088 = dma.vmem_to_hbm [thread:$0]  (%p3060_p5), %s1684_s26, 128, %s1681_s9, %s1670_s21  }
 0xf74 PF: > { %s3061_s23 = sld [smem:[#allocation20_spill]] }
 0xf75   : > { %s3062_s24 = sld [smem:[#allocation14_spill]] }
 0xf76   : > { %s3063_s18 = sld [smem:[#allocation22_spill]] }
 0xf7a   : > { %p2102_p3 = scmp.ge.s32.totalorder %s3061_s23, 2 }
 0xf7b   : > { %s1695_s19 = sand.u32 1, %s3062_s24  }
 0xf7c   : > { %p3064_p4 = scmp.ne.s32.totalorder %s3063_s18, 0  ;;  %s1696_s11 = scalar_lea.sflag [#allocation5], %s1695_s19 }
 0xf7e   : > { %p2098_p9 = pnand %p2102_p3, %p3064_p4 }
 0xf80   : > { %p2099_p10 = pneg %p2098_p9 }
 0xf82   : > { %2371 = dma.done.wait (%p2099_p10), %s1696_s11, 128  }
 0xf83   : > { %2373 = vsyncadd (%p2099_p10), %s1696_s11, 4294967168  ;;  %s33_s23 = sadd.s32 1, %s3061_s23   ;;  %s3065_s29 = sld [smem:[#allocation12_spill]] }
 0xf84   : > { %p30_p11 = scmp.ge.s32.totalorder %s33_s23, 6   ;;  %s3066_s30 = sld [smem:[#allocation13_spill]] }
 0xf85   : > { %s3067_s15 = sld [smem:[#allocation25_spill]] }
 0xf86   : > { %s3068_s16 = sld [smem:[#allocation15_spill]] }
 0xf87   : > { %s3069_s17 = sld [smem:[#allocation16_spill]] }
 0xf88   : > { %s3070_s18 = sld [smem:[#allocation26_spill]]  ;;  %32 = sbr.rel (!%p30_p11) target bundleno = 24 (0x18), region = 175 }
 0xf89   : > { %s3071_s19 = sld [smem:[#allocation18_spill]] }
 0xf8a   : > { %s3072_s20 = sld [smem:[#allocation19_spill]] }
 0xf8b   : > { %s3073_s21 = sld [smem:[#allocation23_spill]] }
 0xf8c   : > { %s3074_s22 = sld [smem:[#allocation24_spill]] }
 0xf8d   :  { %1701 = vsyncpa [#allocation4], 1 }
 0xf8e   :  { %1703 = vsyncpa [#allocation4 + $0x1], 1 }
 0xf8f   :  { %1704 = vsyncpa [#allocation7], 1 }
 0xf90   :  { %1706 = vsyncpa [#allocation7 + $0x1], 1 }
 0xf91   :  { %1707 = vsyncpa [#allocation5], 1 }
 0xf92   :  { %1709 = vsyncpa [#allocation5 + $0x1], 1 }

</bundles_post_ra>
